<compile_context>
chip_gen: v5e
topology: v5e:2x2
jax: 0.10.0
libtpu: 0.0.40
codegen_flags: <defaults>
</compile_context>

<pallas_src>
import math
from functools import partial

import jax
import jax.numpy as jnp
from jax import lax
from jax.experimental import pallas as pl
from jax.experimental.pallas import tpu as pltpu


def _round_up(x: int, m: int) -> int:
    return ((x + m - 1) // m) * m


# ---------------------------------------------------------------------------
# Tiled matmul kernel (bias + optional Swish fused into the epilogue)
# ---------------------------------------------------------------------------
def _matmul_kernel(x_ref, w_ref, b_ref, o_ref, acc_ref, *, activation):
    @pl.when(pl.program_id(2) == 0)
    def _init():
        acc_ref[...] = jnp.zeros_like(acc_ref)

    acc_ref[...] += jnp.dot(x_ref[...], w_ref[...],
                            preferred_element_type=jnp.float32)

    @pl.when(pl.program_id(2) == pl.num_programs(2) - 1)
    def _finalize():
        r = acc_ref[...] + b_ref[...].astype(jnp.float32)
        if activation == "swish":
            r = r * jax.nn.sigmoid(r)
        o_ref[...] = r.astype(o_ref.dtype)


def pallas_matmul(x, w, b=None, activation="none"):
    """act(x @ w + b). x:(M,K), w:(K,N), b:(N,) or None."""
    M, K = x.shape
    K2, N = w.shape
    assert K == K2
    if b is None:
        b = jnp.zeros((N,), jnp.float32)

    tm = 128 if M >= 128 else _round_up(M, 8)
    tn = 128
    tk = 256 if K >= 256 else 128
    Mp, Kp, Np = _round_up(M, tm), _round_up(K, tk), _round_up(N, tn)

    xp = jnp.pad(x, ((0, Mp - M), (0, Kp - K)))
    wp = jnp.pad(w, ((0, Kp - K), (0, Np - N)))
    bp = jnp.pad(b, (0, Np - N)).reshape(1, Np)

    out = pl.pallas_call(
        partial(_matmul_kernel, activation=activation),
        out_shape=jax.ShapeDtypeStruct((Mp, Np), x.dtype),
        grid_spec=pltpu.PrefetchScalarGridSpec(
            num_scalar_prefetch=0,
            grid=(Mp // tm, Np // tn, Kp // tk),
            in_specs=[
                pl.BlockSpec((tm, tk), lambda i, j, k: (i, k)),
                pl.BlockSpec((tk, tn), lambda i, j, k: (k, j)),
                pl.BlockSpec((1, tn), lambda i, j, k: (0, j)),
            ],
            out_specs=pl.BlockSpec((tm, tn), lambda i, j, k: (i, j)),
            scratch_shapes=[pltpu.VMEM((tm, tn), jnp.float32)],
        ),
        compiler_params=pltpu.CompilerParams(
            dimension_semantics=("parallel", "parallel", "arbitrary")),
    )(xp, wp, bp)
    return out[:M, :N]


# ---------------------------------------------------------------------------
# LayerNorm kernel (row-wise over the last dim)
# ---------------------------------------------------------------------------
def _layernorm_kernel(x_ref, g_ref, b_ref, o_ref, *, eps):
    x = x_ref[...].astype(jnp.float32)
    mean = jnp.mean(x, axis=-1, keepdims=True)
    xc = x - mean
    var = jnp.mean(xc * xc, axis=-1, keepdims=True)
    y = xc * lax.rsqrt(var + eps) * g_ref[...].astype(jnp.float32) \
        + b_ref[...].astype(jnp.float32)
    o_ref[...] = y.astype(o_ref.dtype)


def pallas_layernorm(x2d, gamma, beta, eps=1e-5):
    R, D = x2d.shape
    tr = 256 if R >= 256 else _round_up(R, 8)
    Rp = _round_up(R, tr)
    xp = jnp.pad(x2d, ((0, Rp - R), (0, 0)))
    out = pl.pallas_call(
        partial(_layernorm_kernel, eps=eps),
        out_shape=jax.ShapeDtypeStruct((Rp, D), x2d.dtype),
        grid_spec=pltpu.PrefetchScalarGridSpec(
            num_scalar_prefetch=0,
            grid=(Rp // tr,),
            in_specs=[
                pl.BlockSpec((tr, D), lambda i: (i, 0)),
                pl.BlockSpec((1, D), lambda i: (0, 0)),
                pl.BlockSpec((1, D), lambda i: (0, 0)),
            ],
            out_specs=pl.BlockSpec((tr, D), lambda i: (i, 0)),
        ),
        compiler_params=pltpu.CompilerParams(dimension_semantics=("parallel",)),
    )(xp, gamma.reshape(1, D), beta.reshape(1, D))
    return out[:R]


# ---------------------------------------------------------------------------
# GLU (a * sigmoid(gate)) fused with eval-mode BatchNorm1d (per-channel affine)
# ---------------------------------------------------------------------------
def _glu_bn_kernel(a_ref, g_ref, scale_ref, shift_ref, o_ref):
    a = a_ref[...].astype(jnp.float32)
    g = g_ref[...].astype(jnp.float32)
    y = a * jax.nn.sigmoid(g)
    y = y * scale_ref[...] + shift_ref[...]
    o_ref[...] = y.astype(o_ref.dtype)


def pallas_glu_bn(a2d, g2d, scale, shift):
    R, C = a2d.shape
    tr = 256 if R >= 256 else _round_up(R, 8)
    Rp = _round_up(R, tr)
    ap = jnp.pad(a2d, ((0, Rp - R), (0, 0)))
    gp = jnp.pad(g2d, ((0, Rp - R), (0, 0)))
    out = pl.pallas_call(
        _glu_bn_kernel,
        out_shape=jax.ShapeDtypeStruct((Rp, C), a2d.dtype),
        grid_spec=pltpu.PrefetchScalarGridSpec(
            num_scalar_prefetch=0,
            grid=(Rp // tr,),
            in_specs=[
                pl.BlockSpec((tr, C), lambda i: (i, 0)),
                pl.BlockSpec((tr, C), lambda i: (i, 0)),
                pl.BlockSpec((1, C), lambda i: (0, 0)),
                pl.BlockSpec((1, C), lambda i: (0, 0)),
            ],
            out_specs=pl.BlockSpec((tr, C), lambda i: (i, 0)),
        ),
        compiler_params=pltpu.CompilerParams(dimension_semantics=("parallel",)),
    )(ap, gp, scale.reshape(1, C).astype(jnp.float32),
      shift.reshape(1, C).astype(jnp.float32))
    return out[:R]


# ---------------------------------------------------------------------------
# Relative-position attention kernels (one (batch, head) tile per grid step)
# ---------------------------------------------------------------------------
def _pos_score_kernel(qv_ref, p_ref, o_ref):
    qv = qv_ref[...].astype(jnp.float32)     # (S, Dh)
    p = p_ref[...].astype(jnp.float32)       # (S, Dh)
    o_ref[...] = lax.dot_general(qv, p, (((1,), (1,)), ((), ())),
                                 preferred_element_type=jnp.float32)


def pallas_pos_score(qv, p):
    B, H, S, Dh = qv.shape
    return pl.pallas_call(
        _pos_score_kernel,
        out_shape=jax.ShapeDtypeStruct((B, H, S, S), jnp.float32),
        grid_spec=pltpu.PrefetchScalarGridSpec(
            num_scalar_prefetch=0,
            grid=(B, H),
            in_specs=[
                pl.BlockSpec((None, None, S, Dh), lambda b, h: (b, h, 0, 0)),
                pl.BlockSpec((None, None, S, Dh), lambda b, h: (b, h, 0, 0)),
            ],
            out_specs=pl.BlockSpec((None, None, S, S), lambda b, h: (b, h, 0, 0)),
        ),
        compiler_params=pltpu.CompilerParams(
            dimension_semantics=("parallel", "parallel")),
    )(qv, p)


def _attn_kernel(qu_ref, k_ref, pos_ref, v_ref, o_ref, *, scale):
    qu = qu_ref[...].astype(jnp.float32)     # (S, Dh)
    k = k_ref[...].astype(jnp.float32)       # (S, Dh)
    content = lax.dot_general(qu, k, (((1,), (1,)), ((), ())),
                              preferred_element_type=jnp.float32)
    score = (content + pos_ref[...]) * scale
    m = jnp.max(score, axis=-1, keepdims=True)
    e = jnp.exp(score - m)
    attn = e / jnp.sum(e, axis=-1, keepdims=True)
    ctx = jnp.dot(attn, v_ref[...].astype(jnp.float32),
                  preferred_element_type=jnp.float32)
    o_ref[...] = ctx.astype(o_ref.dtype)


def pallas_attention(qu, kt, pos_score, vt, *, scale):
    B, H, S, Dh = qu.shape
    return pl.pallas_call(
        partial(_attn_kernel, scale=scale),
        out_shape=jax.ShapeDtypeStruct((B, H, S, Dh), qu.dtype),
        grid_spec=pltpu.PrefetchScalarGridSpec(
            num_scalar_prefetch=0,
            grid=(B, H),
            in_specs=[
                pl.BlockSpec((None, None, S, Dh), lambda b, h: (b, h, 0, 0)),
                pl.BlockSpec((None, None, S, Dh), lambda b, h: (b, h, 0, 0)),
                pl.BlockSpec((None, None, S, S), lambda b, h: (b, h, 0, 0)),
                pl.BlockSpec((None, None, S, Dh), lambda b, h: (b, h, 0, 0)),
            ],
            out_specs=pl.BlockSpec((None, None, S, Dh), lambda b, h: (b, h, 0, 0)),
        ),
        compiler_params=pltpu.CompilerParams(
            dimension_semantics=("parallel", "parallel")),
    )(qu, kt, pos_score, vt)


# ---------------------------------------------------------------------------
# JAX glue (pure index/shape bookkeeping, no heavy compute)
# ---------------------------------------------------------------------------
def relative_shift(pos_score):
    # Exact transcription of torch _relative_shift (view/reshape trick).
    B, H, S1, S2 = pos_score.shape
    zeros = jnp.zeros((B, H, S1, 1), pos_score.dtype)
    padded = jnp.concatenate([zeros, pos_score], axis=-1)
    padded = padded.reshape(B, H, S2 + 1, S1)
    return padded[:, :, 1:].reshape(B, H, S1, S2)


def positional_encoding(max_len, d_model):
    position = jnp.arange(max_len, dtype=jnp.float32)[:, None]
    div_term = jnp.exp(jnp.arange(0, d_model, 2, dtype=jnp.float32)
                       * -(math.log(10000.0) / d_model))
    pe = jnp.zeros((max_len, d_model), jnp.float32)
    pe = pe.at[:, 0::2].set(jnp.sin(position * div_term))
    pe = pe.at[:, 1::2].set(jnp.cos(position * div_term))
    return pe


def im2col_1d(x, k):
    # x: (B, S, C)  ->  (B, S, C*k); feature order = channel*k + tap, matching
    # torch Conv1d weight (O, I, K) flattened as (I*K).
    B, S, C = x.shape
    pad = (k - 1) // 2
    xp = jnp.pad(x, ((0, 0), (pad, pad), (0, 0)))
    cols = jnp.stack([xp[:, j:j + S, :] for j in range(k)], axis=-1)  # (B,S,C,k)
    return cols.reshape(B, S, C * k)


# ---------------------------------------------------------------------------
# Full block forward (Pallas path)
# ---------------------------------------------------------------------------
def cnnformer_block_pallas(params, x, mask=None):
    B, S, D = x.shape
    H = params["num_heads"]
    Dh = D // H
    k = params["conv_k"]

    # ---------------- MHSA module ----------------
    pe = params["pe"][:S]
    pos = jnp.broadcast_to(pe[None], (B, S, D))
    xn = pallas_layernorm(x.reshape(B * S, D),
                          params["mhsa_ln_g"], params["mhsa_ln_b"])

    q = pallas_matmul(xn, params["Wq"], params["bq"]).reshape(B, S, H, Dh)
    kk = pallas_matmul(xn, params["Wk"], params["bk"]).reshape(B, S, H, Dh)
    v = pallas_matmul(xn, params["Wv"], params["bv"]).reshape(B, S, H, Dh)
    p = pallas_matmul(pos.reshape(B * S, D), params["Wp"]).reshape(B, S, H, Dh)

    qu = (q + params["u_bias"]).transpose(0, 2, 1, 3)   # (B,H,S,Dh)
    qv = (q + params["v_bias"]).transpose(0, 2, 1, 3)
    kt = kk.transpose(0, 2, 1, 3)
    vt = v.transpose(0, 2, 1, 3)
    pt = p.transpose(0, 2, 1, 3)

    pos_score = pallas_pos_score(qv, pt)                # (B,H,S,S) f32
    pos_score = relative_shift(pos_score)
    # NOTE: the reference's `score.masked_fill(...)` result is discarded, so
    # `mask` has no effect; dropout layers are identity (inference).
    ctx = pallas_attention(qu, kt, pos_score, vt, scale=1.0 / math.sqrt(D))
    ctx = ctx.transpose(0, 2, 1, 3).reshape(B * S, D)
    attn_out = pallas_matmul(ctx, params["Wo"], params["bo"]).reshape(B, S, D)
    mhsa_out = attn_out + x

    # ---------------- Conv module ----------------
    y = pallas_layernorm(mhsa_out.reshape(B * S, D),
                         params["conv_ln_g"], params["conv_ln_b"])
    # 1x1 conv (C -> 2C) + Swish, as a fused matmul
    y = pallas_matmul(y, params["pw1_w"], params["pw1_b"], activation="swish")
    y = y.reshape(B, S, 2 * D)
    # full Conv1d (2C -> 2C, kernel k) via im2col + MXU matmul
    cols = im2col_1d(y, k).reshape(B * S, 2 * D * k)
    w_flat = params["conv_w"].transpose(1, 2, 0).reshape(2 * D * k, 2 * D)
    y = pallas_matmul(cols, w_flat, params["conv_b"])          # (B*S, 2D)
    # GLU over channels fused with eval-mode BatchNorm1d
    bn_scale = params["bn_g"] / jnp.sqrt(params["bn_var"] + params["bn_eps"])
    bn_shift = params["bn_b"] - params["bn_mean"] * bn_scale
    y = pallas_glu_bn(y[:, :D], y[:, D:], bn_scale, bn_shift)  # (B*S, D)
    # final 1x1 conv (C -> C)
    y = pallas_matmul(y, params["pw2_w"], params["pw2_b"])
    conv_out = y.reshape(B, S, D) + mhsa_out

    # ---------------- Feed-forward module ----------------
    z = pallas_layernorm(conv_out.reshape(B * S, D),
                         params["ff_ln_g"], params["ff_ln_b"])
    z = pallas_matmul(z, params["ff_w1"], params["ff_b1"], activation="swish")
    z = pallas_matmul(z, params["ff_w2"], params["ff_b2"]).reshape(B, S, D)
    return 0.5 * z + 0.5 * conv_out


# ---------------------------------------------------------------------------
# Pure-JAX reference (mirrors the PyTorch forward) for correctness checking
# ---------------------------------------------------------------------------
def cnnformer_block_ref(params, x, mask=None):
    B, S, D = x.shape
    H = params["num_heads"]
    Dh = D // H
    k = params["conv_k"]

    def layernorm(v, g, b, eps=1e-5):
        mean = jnp.mean(v, axis=-1, keepdims=True)
        var = jnp.mean((v - mean) ** 2, axis=-1, keepdims=True)
        return (v - mean) * lax.rsqrt(var + eps) * g + b

    def swish(v):
        return v * jax.nn.sigmoid(v)

    # MHSA
    pe = params["pe"][:S]
    pos = jnp.broadcast_to(pe[None], (B, S, D))
    xn = layernorm(x, params["mhsa_ln_g"], params["mhsa_ln_b"])
    q = (xn @ params["Wq"] + params["bq"]).reshape(B, S, H, Dh)
    kk = (xn @ params["Wk"] + params["bk"]).reshape(B, S, H, Dh)
    v = (xn @ params["Wv"] + params["bv"]).reshape(B, S, H, Dh)
    p = (pos @ params["Wp"]).reshape(B, S, H, Dh)
    content = jnp.einsum("bshd,bthd->bhst", q + params["u_bias"], kk)
    pos_score = jnp.einsum("bshd,bthd->bhst", q + params["v_bias"], p)
    pos_score = relative_shift(pos_score)
    score = (content + pos_score) / math.sqrt(D)
    attn = jax.nn.softmax(score, axis=-1)
    ctx = jnp.einsum("bhst,bhtd->bshd", attn, v.transpose(0, 2, 1, 3))
    attn_out = ctx.reshape(B, S, D) @ params["Wo"] + params["bo"]
    mhsa_out = attn_out + x

    # Conv module
    y = layernorm(mhsa_out, params["conv_ln_g"], params["conv_ln_b"])
    y = swish(y @ params["pw1_w"] + params["pw1_b"])            # (B,S,2D)
    pad = (k - 1) // 2
    yp = jnp.pad(y, ((0, 0), (pad, pad), (0, 0)))
    conv = jnp.zeros((B, S, 2 * D), jnp.float32)
    for j in range(k):
        conv = conv + jnp.einsum("bsi,oi->bso",
                                 yp[:, j:j + S, :], params["conv_w"][:, :, j])
    conv = conv + params["conv_b"]
    a, g = conv[..., :D], conv[..., D:]
    glu = a * jax.nn.sigmoid(g)
    bn_scale = params["bn_g"] / jnp.sqrt(params["bn_var"] + params["bn_eps"])
    bn_shift = params["bn_b"] - params["bn_mean"] * bn_scale
    ybn = glu * bn_scale + bn_shift
    y2 = ybn @ params["pw2_w"] + params["pw2_b"]
    conv_out = y2 + mhsa_out

    # Feed forward
    z = layernorm(conv_out, params["ff_ln_g"], params["ff_ln_b"])
    z = swish(z @ params["ff_w1"] + params["ff_b1"])
    z = z @ params["ff_w2"] + params["ff_b2"]
    return 0.5 * z + 0.5 * conv_out


# ---------------------------------------------------------------------------
# Deterministic parameter init
# ---------------------------------------------------------------------------
def init_params(key, d_model, num_heads, conv_k, expansion, max_len):
    d_head = d_model // num_heads
    keys = jax.random.split(key, 16)

    def xavier(kk, shape):
        limit = math.sqrt(6.0 / (shape[0] + shape[-1]))
        return jax.random.uniform(kk, shape, jnp.float32, -limit, limit)

    def uni(kk, shape, s):
        return jax.random.uniform(kk, shape, jnp.float32, -s, s)

    C = d_model
    return dict(
        num_heads=num_heads, conv_k=conv_k, bn_eps=1e-5,
        pe=positional_encoding(max_len, d_model),
        # MHSA
        mhsa_ln_g=jnp.ones((d_model,), jnp.float32),
        mhsa_ln_b=jnp.zeros((d_model,), jnp.float32),
        Wq=xavier(keys[0], (d_model, d_model)), bq=jnp.zeros((d_model,), jnp.float32),
        Wk=xavier(keys[1], (d_model, d_model)), bk=jnp.zeros((d_model,), jnp.float32),
        Wv=xavier(keys[2], (d_model, d_model)), bv=jnp.zeros((d_model,), jnp.float32),
        Wp=xavier(keys[3], (d_model, d_model)),
        u_bias=xavier(keys[4], (num_heads, d_head)),
        v_bias=xavier(keys[5], (num_heads, d_head)),
        Wo=xavier(keys[6], (d_model, d_model)), bo=jnp.zeros((d_model,), jnp.float32),
        # Conv module
        conv_ln_g=jnp.ones((C,), jnp.float32), conv_ln_b=jnp.zeros((C,), jnp.float32),
        pw1_w=xavier(keys[7], (C, 2 * C)),
        pw1_b=uni(keys[8], (2 * C,), 1.0 / math.sqrt(C)),
        conv_w=uni(keys[9], (2 * C, 2 * C, conv_k), 1.0 / math.sqrt(2 * C * conv_k)),
        conv_b=uni(keys[10], (2 * C,), 1.0 / math.sqrt(2 * C * conv_k)),
        bn_g=jnp.ones((C,), jnp.float32), bn_b=jnp.zeros((C,), jnp.float32),
        bn_mean=jnp.zeros((C,), jnp.float32), bn_var=jnp.ones((C,), jnp.float32),
        pw2_w=xavier(keys[11], (C, C)),
        pw2_b=uni(keys[12], (C,), 1.0 / math.sqrt(C)),
        # Feed forward
        ff_ln_g=jnp.ones((d_model,), jnp.float32), ff_ln_b=jnp.zeros((d_model,), jnp.float32),
        ff_w1=xavier(keys[13], (d_model, d_model * expansion)),
        ff_b1=jnp.zeros((d_model * expansion,), jnp.float32),
        ff_w2=xavier(keys[14], (d_model * expansion, d_model)),
        ff_b2=jnp.zeros((d_model,), jnp.float32),
    )


if __name__ == "__main__":
    key = jax.random.PRNGKey(0)
    B, S, D, H, K = 2, 16, 32, 4, 5   # small shapes: batch=2, seq=16, hidden=32
    params = init_params(key, d_model=D, num_heads=H, conv_k=K,
                         expansion=4, max_len=1000)
    x = jax.random.normal(jax.random.fold_in(key, 123), (B, S, D), jnp.float32)

    fwd = jax.jit(lambda inp: cnnformer_block_pallas(params, inp))
    out = jax.block_until_ready(fwd(x))

    ref = jax.block_until_ready(
        jax.jit(lambda inp: cnnformer_block_ref(params, inp))(x))

    assert out.shape == (B, S, D), out.shape
    assert out.dtype == jnp.float32
    max_err = float(jnp.max(jnp.abs(out - ref)))
    assert max_err < 2e-3, f"max abs err {max_err}"
    print("KERNEL_OK")
</pallas_src>

<mosaic_0001>
module attributes {stable_mosaic.version = 11 : i64} {
  func.func @_layernorm_kernel(%arg0: i32, %arg1: memref<32x32xf32, #tpu.memory_space<vmem>>, %arg2: memref<1x32xf32, #tpu.memory_space<vmem>>, %arg3: memref<1x32xf32, #tpu.memory_space<vmem>>, %arg4: memref<32x32xf32, #tpu.memory_space<vmem>>) attributes {dimension_semantics = [#tpu.dimension_semantics<parallel>], iteration_bounds = array<i64: 1>, scalar_prefetch = 0 : i64, scratch_operands = 0 : i64, tpu.core_type = #tpu.core_type<tc>, window_params = [{transform_indices = @transform_0, window_bounds = array<i64: 32, 32>}, {pipeline_mode = #tpu.pipeline_mode<synchronous>, transform_indices = @transform_1, window_bounds = array<i64: 1, 32>}, {pipeline_mode = #tpu.pipeline_mode<synchronous>, transform_indices = @transform_2, window_bounds = array<i64: 1, 32>}, {transform_indices = @transform_3, window_bounds = array<i64: 32, 32>}]} {
    %c0 = arith.constant 0 : index
    %c0_0 = arith.constant 0 : index
    %0 = vector.load %arg1[%c0, %c0_0] : memref<32x32xf32, #tpu.memory_space<vmem>>, vector<32x32xf32>
    %cst = arith.constant dense<0.000000e+00> : vector<32xf32>
    %1 = vector.multi_reduction <add>, %0, %cst [1] : vector<32x32xf32> to vector<32xf32>
    %2 = vector.shape_cast %1 : vector<32xf32> to vector<32x1xf32>
    %cst_1 = arith.constant 3.200000e+01 : f32
    %3 = vector.broadcast %cst_1 : f32 to vector<32x1xf32>
    %4 = arith.divf %2, %3 : vector<32x1xf32>
    %5 = vector.broadcast %4 : vector<32x1xf32> to vector<32x32xf32>
    %6 = arith.subf %0, %5 : vector<32x32xf32>
    %7 = arith.mulf %6, %6 : vector<32x32xf32>
    %cst_2 = arith.constant dense<0.000000e+00> : vector<32xf32>
    %8 = vector.multi_reduction <add>, %7, %cst_2 [1] : vector<32x32xf32> to vector<32xf32>
    %9 = vector.shape_cast %8 : vector<32xf32> to vector<32x1xf32>
    %cst_3 = arith.constant 3.200000e+01 : f32
    %10 = vector.broadcast %cst_3 : f32 to vector<32x1xf32>
    %11 = arith.divf %9, %10 : vector<32x1xf32>
    %cst_4 = arith.constant 9.99999974E-6 : f32
    %12 = vector.broadcast %cst_4 : f32 to vector<32x1xf32>
    %13 = arith.addf %11, %12 : vector<32x1xf32>
    %14 = math.rsqrt %13 : vector<32x1xf32>
    %15 = vector.broadcast %14 : vector<32x1xf32> to vector<32x32xf32>
    %16 = arith.mulf %6, %15 : vector<32x32xf32>
    %c0_5 = arith.constant 0 : index
    %c0_6 = arith.constant 0 : index
    %17 = vector.load %arg2[%c0_5, %c0_6] : memref<1x32xf32, #tpu.memory_space<vmem>>, vector<1x32xf32>
    %18 = vector.broadcast %17 : vector<1x32xf32> to vector<32x32xf32>
    %19 = arith.mulf %16, %18 : vector<32x32xf32>
    %c0_7 = arith.constant 0 : index
    %c0_8 = arith.constant 0 : index
    %20 = vector.load %arg3[%c0_7, %c0_8] : memref<1x32xf32, #tpu.memory_space<vmem>>, vector<1x32xf32>
    %21 = vector.broadcast %20 : vector<1x32xf32> to vector<32x32xf32>
    %22 = arith.addf %19, %21 : vector<32x32xf32>
    %c0_9 = arith.constant 0 : index
    %c0_10 = arith.constant 0 : index
    %23 = vector.load %arg4[%c0_9, %c0_10] : memref<32x32xf32, #tpu.memory_space<vmem>>, vector<32x32xf32>
    tpu.vector_store %arg4[%c0_9, %c0_10], %22 {strides = array<i32>} : memref<32x32xf32, #tpu.memory_space<vmem>>, vector<32x32xf32>,
    return
  }
  func.func @transform_0(%arg0: i32) -> (i32, i32) {
    %c0_i32 = arith.constant 0 : i32
    %c0_i32_0 = arith.constant 0 : i32
    return %arg0, %c0_i32 : i32, i32
  }
  func.func @transform_1(%arg0: i32) -> (i32, i32) {
    %c0_i32 = arith.constant 0 : i32
    %c0_i32_0 = arith.constant 0 : i32
    %c0_i32_1 = arith.constant 0 : i32
    return %c0_i32, %c0_i32_0 : i32, i32
  }
  func.func @transform_2(%arg0: i32) -> (i32, i32) {
    %c0_i32 = arith.constant 0 : i32
    %c0_i32_0 = arith.constant 0 : i32
    %c0_i32_1 = arith.constant 0 : i32
    return %c0_i32, %c0_i32_0 : i32, i32
  }
  func.func @transform_3(%arg0: i32) -> (i32, i32) {
    %c0_i32 = arith.constant 0 : i32
    %c0_i32_0 = arith.constant 0 : i32
    return %arg0, %c0_i32 : i32, i32
  }
}

module attributes {stable_mosaic.version = 11 : i64} {
  func.func @_matmul_kernel(%arg0: i32, %arg1: i32, %arg2: i32, %arg3: memref<32x128xf32, #tpu.memory_space<vmem>>, %arg4: memref<128x128xf32, #tpu.memory_space<vmem>>, %arg5: memref<1x128xf32, #tpu.memory_space<vmem>>, %arg6: memref<32x128xf32, #tpu.memory_space<vmem>>, %arg7: memref<32x128xf32, #tpu.memory_space<vmem>>) attributes {dimension_semantics = [#tpu.dimension_semantics<parallel>, #tpu.dimension_semantics<parallel>, #tpu.dimension_semantics<arbitrary>], iteration_bounds = array<i64: 1, 1, 1>, scalar_prefetch = 0 : i64, scratch_operands = 1 : i64, tpu.core_type = #tpu.core_type<tc>, window_params = [{transform_indices = @transform_0, window_bounds = array<i64: 32, 128>}, {transform_indices = @transform_1, window_bounds = array<i64: 128, 128>}, {transform_indices = @transform_2, window_bounds = array<i64: 1, 128>}, {transform_indices = @transform_3, window_bounds = array<i64: 32, 128>}]} {
    %c0_i32 = arith.constant 0 : i32
    %0 = arith.cmpi eq, %arg2, %c0_i32 : i32
    %1 = arith.extui %0 : i1 to i32
    %c0_i32_0 = arith.constant 0 : i32
    %2 = arith.cmpi ne, %1, %c0_i32_0 : i32
    scf.if %2 {
      %cst_10 = arith.constant 0.000000e+00 : f32
      %12 = vector.broadcast %cst_10 : f32 to vector<32x128xf32>
      %c0_11 = arith.constant 0 : index
      %c0_12 = arith.constant 0 : index
      %13 = vector.load %arg7[%c0_11, %c0_12] : memref<32x128xf32, #tpu.memory_space<vmem>>, vector<32x128xf32>
      tpu.vector_store %arg7[%c0_11, %c0_12], %12 {strides = array<i32>} : memref<32x128xf32, #tpu.memory_space<vmem>>, vector<32x128xf32>,
    } else {
    }
    %c0 = arith.constant 0 : index
    %c0_1 = arith.constant 0 : index
    %3 = vector.load %arg7[%c0, %c0_1] : memref<32x128xf32, #tpu.memory_space<vmem>>, vector<32x128xf32>
    %c0_2 = arith.constant 0 : index
    %c0_3 = arith.constant 0 : index
    %4 = vector.load %arg3[%c0_2, %c0_3] : memref<32x128xf32, #tpu.memory_space<vmem>>, vector<32x128xf32>
    %c0_4 = arith.constant 0 : index
    %c0_5 = arith.constant 0 : index
    %5 = vector.load %arg4[%c0_4, %c0_5] : memref<128x128xf32, #tpu.memory_space<vmem>>, vector<128x128xf32>
    %cst = arith.constant dense<0.000000e+00> : vector<32x128xf32>
    %6 = tpu.matmul %4, %5, %cst {dimension_numbers = #tpu.dot_dimension_numbers<[1], [0], [0], [1], [0, 0, 1, 1], [], []>} : vector<32x128xf32>, vector<128x128xf32>, vector<32x128xf32> -> vector<32x128xf32>
    %7 = arith.addf %3, %6 : vector<32x128xf32>
    %c0_6 = arith.constant 0 : index
    %c0_7 = arith.constant 0 : index
    %8 = vector.load %arg7[%c0_6, %c0_7] : memref<32x128xf32, #tpu.memory_space<vmem>>, vector<32x128xf32>
    tpu.vector_store %arg7[%c0_6, %c0_7], %7 {strides = array<i32>} : memref<32x128xf32, #tpu.memory_space<vmem>>, vector<32x128xf32>,
    %c0_i32_8 = arith.constant 0 : i32
    %9 = arith.cmpi eq, %arg2, %c0_i32_8 : i32
    %10 = arith.extui %9 : i1 to i32
    %c0_i32_9 = arith.constant 0 : i32
    %11 = arith.cmpi ne, %10, %c0_i32_9 : i32
    scf.if %11 {
      %c0_10 = arith.constant 0 : index
      %c0_11 = arith.constant 0 : index
      %12 = vector.load %arg7[%c0_10, %c0_11] : memref<32x128xf32, #tpu.memory_space<vmem>>, vector<32x128xf32>
      %c0_12 = arith.constant 0 : index
      %c0_13 = arith.constant 0 : index
      %13 = vector.load %arg5[%c0_12, %c0_13] : memref<1x128xf32, #tpu.memory_space<vmem>>, vector<1x128xf32>
      %14 = vector.broadcast %13 : vector<1x128xf32> to vector<32x128xf32>
      %15 = arith.addf %12, %14 : vector<32x128xf32>
      %c0_14 = arith.constant 0 : index
      %c0_15 = arith.constant 0 : index
      %16 = vector.load %arg6[%c0_14, %c0_15] : memref<32x128xf32, #tpu.memory_space<vmem>>, vector<32x128xf32>
      tpu.vector_store %arg6[%c0_14, %c0_15], %15 {strides = array<i32>} : memref<32x128xf32, #tpu.memory_space<vmem>>, vector<32x128xf32>,
    } else {
    }
    return
  }
  func.func @transform_0(%arg0: i32, %arg1: i32, %arg2: i32) -> (i32, i32) {
    %c0_i32 = arith.constant 0 : i32
    return %arg0, %arg2 : i32, i32
  }
  func.func @transform_1(%arg0: i32, %arg1: i32, %arg2: i32) -> (i32, i32) {
    %c0_i32 = arith.constant 0 : i32
    return %arg2, %arg1 : i32, i32
  }
  func.func @transform_2(%arg0: i32, %arg1: i32, %arg2: i32) -> (i32, i32) {
    %c0_i32 = arith.constant 0 : i32
    %c0_i32_0 = arith.constant 0 : i32
    return %c0_i32, %arg1 : i32, i32
  }
  func.func @transform_3(%arg0: i32, %arg1: i32, %arg2: i32) -> (i32, i32) {
    %c0_i32 = arith.constant 0 : i32
    return %arg0, %arg1 : i32, i32
  }
}

module attributes {stable_mosaic.version = 11 : i64} {
  func.func @_matmul_kernel(%arg0: i32, %arg1: i32, %arg2: i32, %arg3: memref<32x128xf32, #tpu.memory_space<vmem>>, %arg4: memref<128x128xf32, #tpu.memory_space<vmem>>, %arg5: memref<1x128xf32, #tpu.memory_space<vmem>>, %arg6: memref<32x128xf32, #tpu.memory_space<vmem>>, %arg7: memref<32x128xf32, #tpu.memory_space<vmem>>) attributes {dimension_semantics = [#tpu.dimension_semantics<parallel>, #tpu.dimension_semantics<parallel>, #tpu.dimension_semantics<arbitrary>], iteration_bounds = array<i64: 1, 1, 1>, scalar_prefetch = 0 : i64, scratch_operands = 1 : i64, tpu.core_type = #tpu.core_type<tc>, window_params = [{transform_indices = @transform_0, window_bounds = array<i64: 32, 128>}, {transform_indices = @transform_1, window_bounds = array<i64: 128, 128>}, {transform_indices = @transform_2, window_bounds = array<i64: 1, 128>}, {transform_indices = @transform_3, window_bounds = array<i64: 32, 128>}]} {
    %c0_i32 = arith.constant 0 : i32
    %0 = arith.cmpi eq, %arg2, %c0_i32 : i32
    %1 = arith.extui %0 : i1 to i32
    %c0_i32_0 = arith.constant 0 : i32
    %2 = arith.cmpi ne, %1, %c0_i32_0 : i32
    scf.if %2 {
      %cst_10 = arith.constant 0.000000e+00 : f32
      %12 = vector.broadcast %cst_10 : f32 to vector<32x128xf32>
      %c0_11 = arith.constant 0 : index
      %c0_12 = arith.constant 0 : index
      %13 = vector.load %arg7[%c0_11, %c0_12] : memref<32x128xf32, #tpu.memory_space<vmem>>, vector<32x128xf32>
      tpu.vector_store %arg7[%c0_11, %c0_12], %12 {strides = array<i32>} : memref<32x128xf32, #tpu.memory_space<vmem>>, vector<32x128xf32>,
    } else {
    }
    %c0 = arith.constant 0 : index
    %c0_1 = arith.constant 0 : index
    %3 = vector.load %arg7[%c0, %c0_1] : memref<32x128xf32, #tpu.memory_space<vmem>>, vector<32x128xf32>
    %c0_2 = arith.constant 0 : index
    %c0_3 = arith.constant 0 : index
    %4 = vector.load %arg3[%c0_2, %c0_3] : memref<32x128xf32, #tpu.memory_space<vmem>>, vector<32x128xf32>
    %c0_4 = arith.constant 0 : index
    %c0_5 = arith.constant 0 : index
    %5 = vector.load %arg4[%c0_4, %c0_5] : memref<128x128xf32, #tpu.memory_space<vmem>>, vector<128x128xf32>
    %cst = arith.constant dense<0.000000e+00> : vector<32x128xf32>
    %6 = tpu.matmul %4, %5, %cst {dimension_numbers = #tpu.dot_dimension_numbers<[1], [0], [0], [1], [0, 0, 1, 1], [], []>} : vector<32x128xf32>, vector<128x128xf32>, vector<32x128xf32> -> vector<32x128xf32>
    %7 = arith.addf %3, %6 : vector<32x128xf32>
    %c0_6 = arith.constant 0 : index
    %c0_7 = arith.constant 0 : index
    %8 = vector.load %arg7[%c0_6, %c0_7] : memref<32x128xf32, #tpu.memory_space<vmem>>, vector<32x128xf32>
    tpu.vector_store %arg7[%c0_6, %c0_7], %7 {strides = array<i32>} : memref<32x128xf32, #tpu.memory_space<vmem>>, vector<32x128xf32>,
    %c0_i32_8 = arith.constant 0 : i32
    %9 = arith.cmpi eq, %arg2, %c0_i32_8 : i32
    %10 = arith.extui %9 : i1 to i32
    %c0_i32_9 = arith.constant 0 : i32
    %11 = arith.cmpi ne, %10, %c0_i32_9 : i32
    scf.if %11 {
      %c0_10 = arith.constant 0 : index
      %c0_11 = arith.constant 0 : index
      %12 = vector.load %arg7[%c0_10, %c0_11] : memref<32x128xf32, #tpu.memory_space<vmem>>, vector<32x128xf32>
      %c0_12 = arith.constant 0 : index
      %c0_13 = arith.constant 0 : index
      %13 = vector.load %arg5[%c0_12, %c0_13] : memref<1x128xf32, #tpu.memory_space<vmem>>, vector<1x128xf32>
      %14 = vector.broadcast %13 : vector<1x128xf32> to vector<32x128xf32>
      %15 = arith.addf %12, %14 : vector<32x128xf32>
      %c0_14 = arith.constant 0 : index
      %c0_15 = arith.constant 0 : index
      %16 = vector.load %arg6[%c0_14, %c0_15] : memref<32x128xf32, #tpu.memory_space<vmem>>, vector<32x128xf32>
      tpu.vector_store %arg6[%c0_14, %c0_15], %15 {strides = array<i32>} : memref<32x128xf32, #tpu.memory_space<vmem>>, vector<32x128xf32>,
    } else {
    }
    return
  }
  func.func @transform_0(%arg0: i32, %arg1: i32, %arg2: i32) -> (i32, i32) {
    %c0_i32 = arith.constant 0 : i32
    return %arg0, %arg2 : i32, i32
  }
  func.func @transform_1(%arg0: i32, %arg1: i32, %arg2: i32) -> (i32, i32) {
    %c0_i32 = arith.constant 0 : i32
    return %arg2, %arg1 : i32, i32
  }
  func.func @transform_2(%arg0: i32, %arg1: i32, %arg2: i32) -> (i32, i32) {
    %c0_i32 = arith.constant 0 : i32
    %c0_i32_0 = arith.constant 0 : i32
    return %c0_i32, %arg1 : i32, i32
  }
  func.func @transform_3(%arg0: i32, %arg1: i32, %arg2: i32) -> (i32, i32) {
    %c0_i32 = arith.constant 0 : i32
    return %arg0, %arg1 : i32, i32
  }
}

module attributes {stable_mosaic.version = 11 : i64} {
  func.func @_pos_score_kernel(%arg0: i32, %arg1: i32, %arg2: memref<1x1x16x8xf32, #tpu.memory_space<vmem>>, %arg3: memref<1x1x16x8xf32, #tpu.memory_space<vmem>>, %arg4: memref<1x1x16x16xf32, #tpu.memory_space<vmem>>) attributes {dimension_semantics = [#tpu.dimension_semantics<parallel>, #tpu.dimension_semantics<parallel>], iteration_bounds = array<i64: 2, 4>, scalar_prefetch = 0 : i64, scratch_operands = 0 : i64, tpu.core_type = #tpu.core_type<tc>, window_params = [{transform_indices = @transform_0, window_bounds = array<i64: 1, 1, 16, 8>}, {transform_indices = @transform_1, window_bounds = array<i64: 1, 1, 16, 8>}, {transform_indices = @transform_2, window_bounds = array<i64: 1, 1, 16, 16>}]} {
    %c0 = arith.constant 0 : index
    %c0_0 = arith.constant 0 : index
    %c0_1 = arith.constant 0 : index
    %c0_2 = arith.constant 0 : index
    %0 = vector.load %arg2[%c0, %c0_0, %c0_1, %c0_2] : memref<1x1x16x8xf32, #tpu.memory_space<vmem>>, vector<1x1x16x8xf32>
    %1 = vector.shape_cast %0 : vector<1x1x16x8xf32> to vector<16x8xf32>
    %c0_3 = arith.constant 0 : index
    %c0_4 = arith.constant 0 : index
    %c0_5 = arith.constant 0 : index
    %c0_6 = arith.constant 0 : index
    %2 = vector.load %arg3[%c0_3, %c0_4, %c0_5, %c0_6] : memref<1x1x16x8xf32, #tpu.memory_space<vmem>>, vector<1x1x16x8xf32>
    %3 = vector.shape_cast %2 : vector<1x1x16x8xf32> to vector<16x8xf32>
    %cst = arith.constant dense<0.000000e+00> : vector<16x16xf32>
    %4 = tpu.matmul %1, %3, %cst {dimension_numbers = #tpu.dot_dimension_numbers<[1], [1], [0], [0], [0, 0, 1, 0], [], []>} : vector<16x8xf32>, vector<16x8xf32>, vector<16x16xf32> -> vector<16x16xf32>
    %c0_7 = arith.constant 0 : index
    %c0_8 = arith.constant 0 : index
    %c0_9 = arith.constant 0 : index
    %c0_10 = arith.constant 0 : index
    %5 = vector.load %arg4[%c0_7, %c0_8, %c0_9, %c0_10] : memref<1x1x16x16xf32, #tpu.memory_space<vmem>>, vector<1x1x16x16xf32>
    %6 = vector.shape_cast %5 : vector<1x1x16x16xf32> to vector<16x16xf32>
    %7 = vector.shape_cast %4 : vector<16x16xf32> to vector<1x1x16x16xf32>
    tpu.vector_store %arg4[%c0_7, %c0_8, %c0_9, %c0_10], %7 {strides = array<i32>} : memref<1x1x16x16xf32, #tpu.memory_space<vmem>>, vector<1x1x16x16xf32>,
    return
  }
  func.func @transform_0(%arg0: i32, %arg1: i32) -> (i32, i32, i32, i32) {
    %c0_i32 = arith.constant 0 : i32
    %c0_i32_0 = arith.constant 0 : i32
    %c0_i32_1 = arith.constant 0 : i32
    return %arg0, %arg1, %c0_i32, %c0_i32_0 : i32, i32, i32, i32
  }
  func.func @transform_1(%arg0: i32, %arg1: i32) -> (i32, i32, i32, i32) {
    %c0_i32 = arith.constant 0 : i32
    %c0_i32_0 = arith.constant 0 : i32
    %c0_i32_1 = arith.constant 0 : i32
    return %arg0, %arg1, %c0_i32, %c0_i32_0 : i32, i32, i32, i32
  }
  func.func @transform_2(%arg0: i32, %arg1: i32) -> (i32, i32, i32, i32) {
    %c0_i32 = arith.constant 0 : i32
    %c0_i32_0 = arith.constant 0 : i32
    %c0_i32_1 = arith.constant 0 : i32
    return %arg0, %arg1, %c0_i32, %c0_i32_0 : i32, i32, i32, i32
  }
}

module attributes {stable_mosaic.version = 11 : i64} {
  func.func @_attn_kernel(%arg0: i32, %arg1: i32, %arg2: memref<1x1x16x8xf32, #tpu.memory_space<vmem>>, %arg3: memref<1x1x16x8xf32, #tpu.memory_space<vmem>>, %arg4: memref<1x1x16x16xf32, #tpu.memory_space<vmem>>, %arg5: memref<1x1x16x8xf32, #tpu.memory_space<vmem>>, %arg6: memref<1x1x16x8xf32, #tpu.memory_space<vmem>>) attributes {dimension_semantics = [#tpu.dimension_semantics<parallel>, #tpu.dimension_semantics<parallel>], iteration_bounds = array<i64: 2, 4>, scalar_prefetch = 0 : i64, scratch_operands = 0 : i64, tpu.core_type = #tpu.core_type<tc>, window_params = [{transform_indices = @transform_0, window_bounds = array<i64: 1, 1, 16, 8>}, {transform_indices = @transform_1, window_bounds = array<i64: 1, 1, 16, 8>}, {transform_indices = @transform_2, window_bounds = array<i64: 1, 1, 16, 16>}, {transform_indices = @transform_3, window_bounds = array<i64: 1, 1, 16, 8>}, {transform_indices = @transform_4, window_bounds = array<i64: 1, 1, 16, 8>}]} {
    %c0 = arith.constant 0 : index
    %c0_0 = arith.constant 0 : index
    %c0_1 = arith.constant 0 : index
    %c0_2 = arith.constant 0 : index
    %0 = vector.load %arg2[%c0, %c0_0, %c0_1, %c0_2] : memref<1x1x16x8xf32, #tpu.memory_space<vmem>>, vector<1x1x16x8xf32>
    %1 = vector.shape_cast %0 : vector<1x1x16x8xf32> to vector<16x8xf32>
    %c0_3 = arith.constant 0 : index
    %c0_4 = arith.constant 0 : index
    %c0_5 = arith.constant 0 : index
    %c0_6 = arith.constant 0 : index
    %2 = vector.load %arg3[%c0_3, %c0_4, %c0_5, %c0_6] : memref<1x1x16x8xf32, #tpu.memory_space<vmem>>, vector<1x1x16x8xf32>
    %3 = vector.shape_cast %2 : vector<1x1x16x8xf32> to vector<16x8xf32>
    %cst = arith.constant dense<0.000000e+00> : vector<16x16xf32>
    %4 = tpu.matmul %1, %3, %cst {dimension_numbers = #tpu.dot_dimension_numbers<[1], [1], [0], [0], [0, 0, 1, 0], [], []>} : vector<16x8xf32>, vector<16x8xf32>, vector<16x16xf32> -> vector<16x16xf32>
    %c0_7 = arith.constant 0 : index
    %c0_8 = arith.constant 0 : index
    %c0_9 = arith.constant 0 : index
    %c0_10 = arith.constant 0 : index
    %5 = vector.load %arg4[%c0_7, %c0_8, %c0_9, %c0_10] : memref<1x1x16x16xf32, #tpu.memory_space<vmem>>, vector<1x1x16x16xf32>
    %6 = vector.shape_cast %5 : vector<1x1x16x16xf32> to vector<16x16xf32>
    %7 = arith.addf %4, %6 : vector<16x16xf32>
    %cst_11 = arith.constant 0.176776692 : f32
    %8 = vector.broadcast %cst_11 : f32 to vector<16x16xf32>
    %9 = arith.mulf %7, %8 : vector<16x16xf32>
    %cst_12 = arith.constant dense<0xFF800000> : vector<16xf32>
    %10 = vector.multi_reduction <maximumf>, %9, %cst_12 [1] : vector<16x16xf32> to vector<16xf32>
    %11 = vector.shape_cast %10 : vector<16xf32> to vector<16x1xf32>
    %12 = vector.broadcast %11 : vector<16x1xf32> to vector<16x16xf32>
    %13 = arith.subf %9, %12 : vector<16x16xf32>
    %14 = math.exp %13 : vector<16x16xf32>
    %cst_13 = arith.constant dense<0.000000e+00> : vector<16xf32>
    %15 = vector.multi_reduction <add>, %14, %cst_13 [1] : vector<16x16xf32> to vector<16xf32>
    %16 = vector.shape_cast %15 : vector<16xf32> to vector<16x1xf32>
    %17 = vector.broadcast %16 : vector<16x1xf32> to vector<16x16xf32>
    %18 = arith.divf %14, %17 : vector<16x16xf32>
    %c0_14 = arith.constant 0 : index
    %c0_15 = arith.constant 0 : index
    %c0_16 = arith.constant 0 : index
    %c0_17 = arith.constant 0 : index
    %19 = vector.load %arg5[%c0_14, %c0_15, %c0_16, %c0_17] : memref<1x1x16x8xf32, #tpu.memory_space<vmem>>, vector<1x1x16x8xf32>
    %20 = vector.shape_cast %19 : vector<1x1x16x8xf32> to vector<16x8xf32>
    %cst_18 = arith.constant dense<0.000000e+00> : vector<16x8xf32>
    %21 = tpu.matmul %18, %20, %cst_18 {dimension_numbers = #tpu.dot_dimension_numbers<[1], [0], [0], [1], [0, 0, 1, 1], [], []>} : vector<16x16xf32>, vector<16x8xf32>, vector<16x8xf32> -> vector<16x8xf32>
    %c0_19 = arith.constant 0 : index
    %c0_20 = arith.constant 0 : index
    %c0_21 = arith.constant 0 : index
    %c0_22 = arith.constant 0 : index
    %22 = vector.load %arg6[%c0_19, %c0_20, %c0_21, %c0_22] : memref<1x1x16x8xf32, #tpu.memory_space<vmem>>, vector<1x1x16x8xf32>
    %23 = vector.shape_cast %22 : vector<1x1x16x8xf32> to vector<16x8xf32>
    %24 = vector.shape_cast %21 : vector<16x8xf32> to vector<1x1x16x8xf32>
    tpu.vector_store %arg6[%c0_19, %c0_20, %c0_21, %c0_22], %24 {strides = array<i32>} : memref<1x1x16x8xf32, #tpu.memory_space<vmem>>, vector<1x1x16x8xf32>,
    return
  }
  func.func @transform_0(%arg0: i32, %arg1: i32) -> (i32, i32, i32, i32) {
    %c0_i32 = arith.constant 0 : i32
    %c0_i32_0 = arith.constant 0 : i32
    %c0_i32_1 = arith.constant 0 : i32
    return %arg0, %arg1, %c0_i32, %c0_i32_0 : i32, i32, i32, i32
  }
  func.func @transform_1(%arg0: i32, %arg1: i32) -> (i32, i32, i32, i32) {
    %c0_i32 = arith.constant 0 : i32
    %c0_i32_0 = arith.constant 0 : i32
    %c0_i32_1 = arith.constant 0 : i32
    return %arg0, %arg1, %c0_i32, %c0_i32_0 : i32, i32, i32, i32
  }
  func.func @transform_2(%arg0: i32, %arg1: i32) -> (i32, i32, i32, i32) {
    %c0_i32 = arith.constant 0 : i32
    %c0_i32_0 = arith.constant 0 : i32
    %c0_i32_1 = arith.constant 0 : i32
    return %arg0, %arg1, %c0_i32, %c0_i32_0 : i32, i32, i32, i32
  }
  func.func @transform_3(%arg0: i32, %arg1: i32) -> (i32, i32, i32, i32) {
    %c0_i32 = arith.constant 0 : i32
    %c0_i32_0 = arith.constant 0 : i32
    %c0_i32_1 = arith.constant 0 : i32
    return %arg0, %arg1, %c0_i32, %c0_i32_0 : i32, i32, i32, i32
  }
  func.func @transform_4(%arg0: i32, %arg1: i32) -> (i32, i32, i32, i32) {
    %c0_i32 = arith.constant 0 : i32
    %c0_i32_0 = arith.constant 0 : i32
    %c0_i32_1 = arith.constant 0 : i32
    return %arg0, %arg1, %c0_i32, %c0_i32_0 : i32, i32, i32, i32
  }
}

module attributes {stable_mosaic.version = 11 : i64} {
  func.func @_matmul_kernel(%arg0: i32, %arg1: i32, %arg2: i32, %arg3: memref<32x128xf32, #tpu.memory_space<vmem>>, %arg4: memref<128x128xf32, #tpu.memory_space<vmem>>, %arg5: memref<1x128xf32, #tpu.memory_space<vmem>>, %arg6: memref<32x128xf32, #tpu.memory_space<vmem>>, %arg7: memref<32x128xf32, #tpu.memory_space<vmem>>) attributes {dimension_semantics = [#tpu.dimension_semantics<parallel>, #tpu.dimension_semantics<parallel>, #tpu.dimension_semantics<arbitrary>], iteration_bounds = array<i64: 1, 1, 1>, scalar_prefetch = 0 : i64, scratch_operands = 1 : i64, tpu.core_type = #tpu.core_type<tc>, window_params = [{transform_indices = @transform_0, window_bounds = array<i64: 32, 128>}, {transform_indices = @transform_1, window_bounds = array<i64: 128, 128>}, {transform_indices = @transform_2, window_bounds = array<i64: 1, 128>}, {transform_indices = @transform_3, window_bounds = array<i64: 32, 128>}]} {
    %c0_i32 = arith.constant 0 : i32
    %0 = arith.cmpi eq, %arg2, %c0_i32 : i32
    %1 = arith.extui %0 : i1 to i32
    %c0_i32_0 = arith.constant 0 : i32
    %2 = arith.cmpi ne, %1, %c0_i32_0 : i32
    scf.if %2 {
      %cst_10 = arith.constant 0.000000e+00 : f32
      %12 = vector.broadcast %cst_10 : f32 to vector<32x128xf32>
      %c0_11 = arith.constant 0 : index
      %c0_12 = arith.constant 0 : index
      %13 = vector.load %arg7[%c0_11, %c0_12] : memref<32x128xf32, #tpu.memory_space<vmem>>, vector<32x128xf32>
      tpu.vector_store %arg7[%c0_11, %c0_12], %12 {strides = array<i32>} : memref<32x128xf32, #tpu.memory_space<vmem>>, vector<32x128xf32>,
    } else {
    }
    %c0 = arith.constant 0 : index
    %c0_1 = arith.constant 0 : index
    %3 = vector.load %arg7[%c0, %c0_1] : memref<32x128xf32, #tpu.memory_space<vmem>>, vector<32x128xf32>
    %c0_2 = arith.constant 0 : index
    %c0_3 = arith.constant 0 : index
    %4 = vector.load %arg3[%c0_2, %c0_3] : memref<32x128xf32, #tpu.memory_space<vmem>>, vector<32x128xf32>
    %c0_4 = arith.constant 0 : index
    %c0_5 = arith.constant 0 : index
    %5 = vector.load %arg4[%c0_4, %c0_5] : memref<128x128xf32, #tpu.memory_space<vmem>>, vector<128x128xf32>
    %cst = arith.constant dense<0.000000e+00> : vector<32x128xf32>
    %6 = tpu.matmul %4, %5, %cst {dimension_numbers = #tpu.dot_dimension_numbers<[1], [0], [0], [1], [0, 0, 1, 1], [], []>} : vector<32x128xf32>, vector<128x128xf32>, vector<32x128xf32> -> vector<32x128xf32>
    %7 = arith.addf %3, %6 : vector<32x128xf32>
    %c0_6 = arith.constant 0 : index
    %c0_7 = arith.constant 0 : index
    %8 = vector.load %arg7[%c0_6, %c0_7] : memref<32x128xf32, #tpu.memory_space<vmem>>, vector<32x128xf32>
    tpu.vector_store %arg7[%c0_6, %c0_7], %7 {strides = array<i32>} : memref<32x128xf32, #tpu.memory_space<vmem>>, vector<32x128xf32>,
    %c0_i32_8 = arith.constant 0 : i32
    %9 = arith.cmpi eq, %arg2, %c0_i32_8 : i32
    %10 = arith.extui %9 : i1 to i32
    %c0_i32_9 = arith.constant 0 : i32
    %11 = arith.cmpi ne, %10, %c0_i32_9 : i32
    scf.if %11 {
      %c0_10 = arith.constant 0 : index
      %c0_11 = arith.constant 0 : index
      %12 = vector.load %arg7[%c0_10, %c0_11] : memref<32x128xf32, #tpu.memory_space<vmem>>, vector<32x128xf32>
      %c0_12 = arith.constant 0 : index
      %c0_13 = arith.constant 0 : index
      %13 = vector.load %arg5[%c0_12, %c0_13] : memref<1x128xf32, #tpu.memory_space<vmem>>, vector<1x128xf32>
      %14 = vector.broadcast %13 : vector<1x128xf32> to vector<32x128xf32>
      %15 = arith.addf %12, %14 : vector<32x128xf32>
      %16 = arith.negf %15 : vector<32x128xf32>
      %17 = math.exp %16 : vector<32x128xf32>
      %cst_14 = arith.constant 1.000000e+00 : f32
      %18 = vector.broadcast %cst_14 : f32 to vector<32x128xf32>
      %19 = arith.addf %18, %17 : vector<32x128xf32>
      %20 = arith.divf %18, %19 : vector<32x128xf32>
      %21 = arith.mulf %15, %20 : vector<32x128xf32>
      %c0_15 = arith.constant 0 : index
      %c0_16 = arith.constant 0 : index
      %22 = vector.load %arg6[%c0_15, %c0_16] : memref<32x128xf32, #tpu.memory_space<vmem>>, vector<32x128xf32>
      tpu.vector_store %arg6[%c0_15, %c0_16], %21 {strides = array<i32>} : memref<32x128xf32, #tpu.memory_space<vmem>>, vector<32x128xf32>,
    } else {
    }
    return
  }
  func.func @transform_0(%arg0: i32, %arg1: i32, %arg2: i32) -> (i32, i32) {
    %c0_i32 = arith.constant 0 : i32
    return %arg0, %arg2 : i32, i32
  }
  func.func @transform_1(%arg0: i32, %arg1: i32, %arg2: i32) -> (i32, i32) {
    %c0_i32 = arith.constant 0 : i32
    return %arg2, %arg1 : i32, i32
  }
  func.func @transform_2(%arg0: i32, %arg1: i32, %arg2: i32) -> (i32, i32) {
    %c0_i32 = arith.constant 0 : i32
    %c0_i32_0 = arith.constant 0 : i32
    return %c0_i32, %arg1 : i32, i32
  }
  func.func @transform_3(%arg0: i32, %arg1: i32, %arg2: i32) -> (i32, i32) {
    %c0_i32 = arith.constant 0 : i32
    return %arg0, %arg1 : i32, i32
  }
}

module attributes {stable_mosaic.version = 11 : i64} {
  func.func @_layernorm_kernel(%arg0: i32, %arg1: memref<32x32xf32, #tpu.memory_space<vmem>>, %arg2: memref<1x32xf32, #tpu.memory_space<vmem>>, %arg3: memref<1x32xf32, #tpu.memory_space<vmem>>, %arg4: memref<32x32xf32, #tpu.memory_space<vmem>>) attributes {dimension_semantics = [#tpu.dimension_semantics<parallel>], iteration_bounds = array<i64: 1>, scalar_prefetch = 0 : i64, scratch_operands = 0 : i64, tpu.core_type = #tpu.core_type<tc>, window_params = [{transform_indices = @transform_0, window_bounds = array<i64: 32, 32>}, {pipeline_mode = #tpu.pipeline_mode<synchronous>, transform_indices = @transform_1, window_bounds = array<i64: 1, 32>}, {pipeline_mode = #tpu.pipeline_mode<synchronous>, transform_indices = @transform_2, window_bounds = array<i64: 1, 32>}, {transform_indices = @transform_3, window_bounds = array<i64: 32, 32>}]} {
    %c0 = arith.constant 0 : index
    %c0_0 = arith.constant 0 : index
    %0 = vector.load %arg1[%c0, %c0_0] : memref<32x32xf32, #tpu.memory_space<vmem>>, vector<32x32xf32>
    %cst = arith.constant dense<0.000000e+00> : vector<32xf32>
    %1 = vector.multi_reduction <add>, %0, %cst [1] : vector<32x32xf32> to vector<32xf32>
    %2 = vector.shape_cast %1 : vector<32xf32> to vector<32x1xf32>
    %cst_1 = arith.constant 3.200000e+01 : f32
    %3 = vector.broadcast %cst_1 : f32 to vector<32x1xf32>
    %4 = arith.divf %2, %3 : vector<32x1xf32>
    %5 = vector.broadcast %4 : vector<32x1xf32> to vector<32x32xf32>
    %6 = arith.subf %0, %5 : vector<32x32xf32>
    %7 = arith.mulf %6, %6 : vector<32x32xf32>
    %cst_2 = arith.constant dense<0.000000e+00> : vector<32xf32>
    %8 = vector.multi_reduction <add>, %7, %cst_2 [1] : vector<32x32xf32> to vector<32xf32>
    %9 = vector.shape_cast %8 : vector<32xf32> to vector<32x1xf32>
    %cst_3 = arith.constant 3.200000e+01 : f32
    %10 = vector.broadcast %cst_3 : f32 to vector<32x1xf32>
    %11 = arith.divf %9, %10 : vector<32x1xf32>
    %cst_4 = arith.constant 9.99999974E-6 : f32
    %12 = vector.broadcast %cst_4 : f32 to vector<32x1xf32>
    %13 = arith.addf %11, %12 : vector<32x1xf32>
    %14 = math.rsqrt %13 : vector<32x1xf32>
    %15 = vector.broadcast %14 : vector<32x1xf32> to vector<32x32xf32>
    %16 = arith.mulf %6, %15 : vector<32x32xf32>
    %c0_5 = arith.constant 0 : index
    %c0_6 = arith.constant 0 : index
    %17 = vector.load %arg2[%c0_5, %c0_6] : memref<1x32xf32, #tpu.memory_space<vmem>>, vector<1x32xf32>
    %18 = vector.broadcast %17 : vector<1x32xf32> to vector<32x32xf32>
    %19 = arith.mulf %16, %18 : vector<32x32xf32>
    %c0_7 = arith.constant 0 : index
    %c0_8 = arith.constant 0 : index
    %20 = vector.load %arg3[%c0_7, %c0_8] : memref<1x32xf32, #tpu.memory_space<vmem>>, vector<1x32xf32>
    %21 = vector.broadcast %20 : vector<1x32xf32> to vector<32x32xf32>
    %22 = arith.addf %19, %21 : vector<32x32xf32>
    %c0_9 = arith.constant 0 : index
    %c0_10 = arith.constant 0 : index
    %23 = vector.load %arg4[%c0_9, %c0_10] : memref<32x32xf32, #tpu.memory_space<vmem>>, vector<32x32xf32>
    tpu.vector_store %arg4[%c0_9, %c0_10], %22 {strides = array<i32>} : memref<32x32xf32, #tpu.memory_space<vmem>>, vector<32x32xf32>,
    return
  }
  func.func @transform_0(%arg0: i32) -> (i32, i32) {
    %c0_i32 = arith.constant 0 : i32
    %c0_i32_0 = arith.constant 0 : i32
    return %arg0, %c0_i32 : i32, i32
  }
  func.func @transform_1(%arg0: i32) -> (i32, i32) {
    %c0_i32 = arith.constant 0 : i32
    %c0_i32_0 = arith.constant 0 : i32
    %c0_i32_1 = arith.constant 0 : i32
    return %c0_i32, %c0_i32_0 : i32, i32
  }
  func.func @transform_2(%arg0: i32) -> (i32, i32) {
    %c0_i32 = arith.constant 0 : i32
    %c0_i32_0 = arith.constant 0 : i32
    %c0_i32_1 = arith.constant 0 : i32
    return %c0_i32, %c0_i32_0 : i32, i32
  }
  func.func @transform_3(%arg0: i32) -> (i32, i32) {
    %c0_i32 = arith.constant 0 : i32
    %c0_i32_0 = arith.constant 0 : i32
    return %arg0, %c0_i32 : i32, i32
  }
}

module attributes {stable_mosaic.version = 11 : i64} {
  func.func @_matmul_kernel(%arg0: i32, %arg1: i32, %arg2: i32, %arg3: memref<32x256xf32, #tpu.memory_space<vmem>>, %arg4: memref<256x128xf32, #tpu.memory_space<vmem>>, %arg5: memref<1x128xf32, #tpu.memory_space<vmem>>, %arg6: memref<32x128xf32, #tpu.memory_space<vmem>>, %arg7: memref<32x128xf32, #tpu.memory_space<vmem>>) attributes {dimension_semantics = [#tpu.dimension_semantics<parallel>, #tpu.dimension_semantics<parallel>, #tpu.dimension_semantics<arbitrary>], iteration_bounds = array<i64: 1, 1, 2>, scalar_prefetch = 0 : i64, scratch_operands = 1 : i64, tpu.core_type = #tpu.core_type<tc>, window_params = [{transform_indices = @transform_0, window_bounds = array<i64: 32, 256>}, {transform_indices = @transform_1, window_bounds = array<i64: 256, 128>}, {transform_indices = @transform_2, window_bounds = array<i64: 1, 128>}, {transform_indices = @transform_3, window_bounds = array<i64: 32, 128>}]} {
    %c0_i32 = arith.constant 0 : i32
    %0 = arith.cmpi eq, %arg2, %c0_i32 : i32
    %1 = arith.extui %0 : i1 to i32
    %c0_i32_0 = arith.constant 0 : i32
    %2 = arith.cmpi ne, %1, %c0_i32_0 : i32
    scf.if %2 {
      %cst_9 = arith.constant 0.000000e+00 : f32
      %12 = vector.broadcast %cst_9 : f32 to vector<32x128xf32>
      %c0_10 = arith.constant 0 : index
      %c0_11 = arith.constant 0 : index
      %13 = vector.load %arg7[%c0_10, %c0_11] : memref<32x128xf32, #tpu.memory_space<vmem>>, vector<32x128xf32>
      tpu.vector_store %arg7[%c0_10, %c0_11], %12 {strides = array<i32>} : memref<32x128xf32, #tpu.memory_space<vmem>>, vector<32x128xf32>,
    } else {
    }
    %c0 = arith.constant 0 : index
    %c0_1 = arith.constant 0 : index
    %3 = vector.load %arg7[%c0, %c0_1] : memref<32x128xf32, #tpu.memory_space<vmem>>, vector<32x128xf32>
    %c0_2 = arith.constant 0 : index
    %c0_3 = arith.constant 0 : index
    %4 = vector.load %arg3[%c0_2, %c0_3] : memref<32x256xf32, #tpu.memory_space<vmem>>, vector<32x256xf32>
    %c0_4 = arith.constant 0 : index
    %c0_5 = arith.constant 0 : index
    %5 = vector.load %arg4[%c0_4, %c0_5] : memref<256x128xf32, #tpu.memory_space<vmem>>, vector<256x128xf32>
    %cst = arith.constant dense<0.000000e+00> : vector<32x128xf32>
    %6 = tpu.matmul %4, %5, %cst {dimension_numbers = #tpu.dot_dimension_numbers<[1], [0], [0], [1], [0, 0, 1, 1], [], []>} : vector<32x256xf32>, vector<256x128xf32>, vector<32x128xf32> -> vector<32x128xf32>
    %7 = arith.addf %3, %6 : vector<32x128xf32>
    %c0_6 = arith.constant 0 : index
    %c0_7 = arith.constant 0 : index
    %8 = vector.load %arg7[%c0_6, %c0_7] : memref<32x128xf32, #tpu.memory_space<vmem>>, vector<32x128xf32>
    tpu.vector_store %arg7[%c0_6, %c0_7], %7 {strides = array<i32>} : memref<32x128xf32, #tpu.memory_space<vmem>>, vector<32x128xf32>,
    %c1_i32 = arith.constant 1 : i32
    %9 = arith.cmpi eq, %arg2, %c1_i32 : i32
    %10 = arith.extui %9 : i1 to i32
    %c0_i32_8 = arith.constant 0 : i32
    %11 = arith.cmpi ne, %10, %c0_i32_8 : i32
    scf.if %11 {
      %c0_9 = arith.constant 0 : index
      %c0_10 = arith.constant 0 : index
      %12 = vector.load %arg7[%c0_9, %c0_10] : memref<32x128xf32, #tpu.memory_space<vmem>>, vector<32x128xf32>
      %c0_11 = arith.constant 0 : index
      %c0_12 = arith.constant 0 : index
      %13 = vector.load %arg5[%c0_11, %c0_12] : memref<1x128xf32, #tpu.memory_space<vmem>>, vector<1x128xf32>
      %14 = vector.broadcast %13 : vector<1x128xf32> to vector<32x128xf32>
      %15 = arith.addf %12, %14 : vector<32x128xf32>
      %c0_13 = arith.constant 0 : index
      %c0_14 = arith.constant 0 : index
      %16 = vector.load %arg6[%c0_13, %c0_14] : memref<32x128xf32, #tpu.memory_space<vmem>>, vector<32x128xf32>
      tpu.vector_store %arg6[%c0_13, %c0_14], %15 {strides = array<i32>} : memref<32x128xf32, #tpu.memory_space<vmem>>, vector<32x128xf32>,
    } else {
    }
    return
  }
  func.func @transform_0(%arg0: i32, %arg1: i32, %arg2: i32) -> (i32, i32) {
    %c0_i32 = arith.constant 0 : i32
    return %arg0, %arg2 : i32, i32
  }
  func.func @transform_1(%arg0: i32, %arg1: i32, %arg2: i32) -> (i32, i32) {
    %c0_i32 = arith.constant 0 : i32
    return %arg2, %arg1 : i32, i32
  }
  func.func @transform_2(%arg0: i32, %arg1: i32, %arg2: i32) -> (i32, i32) {
    %c0_i32 = arith.constant 0 : i32
    %c0_i32_0 = arith.constant 0 : i32
    return %c0_i32, %arg1 : i32, i32
  }
  func.func @transform_3(%arg0: i32, %arg1: i32, %arg2: i32) -> (i32, i32) {
    %c0_i32 = arith.constant 0 : i32
    return %arg0, %arg1 : i32, i32
  }
}

module attributes {stable_mosaic.version = 11 : i64} {
  func.func @_glu_bn_kernel(%arg0: i32, %arg1: memref<32x32xf32, #tpu.memory_space<vmem>>, %arg2: memref<32x32xf32, #tpu.memory_space<vmem>>, %arg3: memref<1x32xf32, #tpu.memory_space<vmem>>, %arg4: memref<1x32xf32, #tpu.memory_space<vmem>>, %arg5: memref<32x32xf32, #tpu.memory_space<vmem>>) attributes {dimension_semantics = [#tpu.dimension_semantics<parallel>], iteration_bounds = array<i64: 1>, scalar_prefetch = 0 : i64, scratch_operands = 0 : i64, tpu.core_type = #tpu.core_type<tc>, window_params = [{transform_indices = @transform_0, window_bounds = array<i64: 32, 32>}, {transform_indices = @transform_1, window_bounds = array<i64: 32, 32>}, {pipeline_mode = #tpu.pipeline_mode<synchronous>, transform_indices = @transform_2, window_bounds = array<i64: 1, 32>}, {pipeline_mode = #tpu.pipeline_mode<synchronous>, transform_indices = @transform_3, window_bounds = array<i64: 1, 32>}, {transform_indices = @transform_4, window_bounds = array<i64: 32, 32>}]} {
    %c0 = arith.constant 0 : index
    %c0_0 = arith.constant 0 : index
    %0 = vector.load %arg1[%c0, %c0_0] : memref<32x32xf32, #tpu.memory_space<vmem>>, vector<32x32xf32>
    %c0_1 = arith.constant 0 : index
    %c0_2 = arith.constant 0 : index
    %1 = vector.load %arg2[%c0_1, %c0_2] : memref<32x32xf32, #tpu.memory_space<vmem>>, vector<32x32xf32>
    %2 = arith.negf %1 : vector<32x32xf32>
    %3 = math.exp %2 : vector<32x32xf32>
    %cst = arith.constant 1.000000e+00 : f32
    %4 = vector.broadcast %cst : f32 to vector<32x32xf32>
    %5 = arith.addf %4, %3 : vector<32x32xf32>
    %6 = arith.divf %4, %5 : vector<32x32xf32>
    %7 = arith.mulf %0, %6 : vector<32x32xf32>
    %c0_3 = arith.constant 0 : index
    %c0_4 = arith.constant 0 : index
    %8 = vector.load %arg3[%c0_3, %c0_4] : memref<1x32xf32, #tpu.memory_space<vmem>>, vector<1x32xf32>
    %9 = vector.broadcast %8 : vector<1x32xf32> to vector<32x32xf32>
    %10 = arith.mulf %7, %9 : vector<32x32xf32>
    %c0_5 = arith.constant 0 : index
    %c0_6 = arith.constant 0 : index
    %11 = vector.load %arg4[%c0_5, %c0_6] : memref<1x32xf32, #tpu.memory_space<vmem>>, vector<1x32xf32>
    %12 = vector.broadcast %11 : vector<1x32xf32> to vector<32x32xf32>
    %13 = arith.addf %10, %12 : vector<32x32xf32>
    %c0_7 = arith.constant 0 : index
    %c0_8 = arith.constant 0 : index
    %14 = vector.load %arg5[%c0_7, %c0_8] : memref<32x32xf32, #tpu.memory_space<vmem>>, vector<32x32xf32>
    tpu.vector_store %arg5[%c0_7, %c0_8], %13 {strides = array<i32>} : memref<32x32xf32, #tpu.memory_space<vmem>>, vector<32x32xf32>,
    return
  }
  func.func @transform_0(%arg0: i32) -> (i32, i32) {
    %c0_i32 = arith.constant 0 : i32
    %c0_i32_0 = arith.constant 0 : i32
    return %arg0, %c0_i32 : i32, i32
  }
  func.func @transform_1(%arg0: i32) -> (i32, i32) {
    %c0_i32 = arith.constant 0 : i32
    %c0_i32_0 = arith.constant 0 : i32
    return %arg0, %c0_i32 : i32, i32
  }
  func.func @transform_2(%arg0: i32) -> (i32, i32) {
    %c0_i32 = arith.constant 0 : i32
    %c0_i32_0 = arith.constant 0 : i32
    %c0_i32_1 = arith.constant 0 : i32
    return %c0_i32, %c0_i32_0 : i32, i32
  }
  func.func @transform_3(%arg0: i32) -> (i32, i32) {
    %c0_i32 = arith.constant 0 : i32
    %c0_i32_0 = arith.constant 0 : i32
    %c0_i32_1 = arith.constant 0 : i32
    return %c0_i32, %c0_i32_0 : i32, i32
  }
  func.func @transform_4(%arg0: i32) -> (i32, i32) {
    %c0_i32 = arith.constant 0 : i32
    %c0_i32_0 = arith.constant 0 : i32
    return %arg0, %c0_i32 : i32, i32
  }
}

</mosaic_0001>

<bundles_post_ra>
// kernel: _lambda_.20
= control target key start
LH: loop header
LB: loop body
LE: loop exit
PB: predicated region body
PF: predicated region fallthrough
CT: control target
= control target key end

     0   :  { %s250_s1 = inlined_call_operand.vmem [shape: f32[128,128], index: 1, kind: input, shape index: {}]   ;;  %s251_s2 = inlined_call_operand.vmem [shape: f32[1,128], index: 2, kind: input, shape index: {}]   ;;  %s252_s0 = inlined_call_operand.vmem [shape: f32[32,128], index: 0, kind: input, shape index: {}]   ;;  %s253_s3 = inlined_call_operand.vmem [shape: f32[32,128], index: 3, kind: output, shape index: {}]  }
   0x1   :  { %v45_v0 = vld [vmem:[%s250_s1 + $0x78] sm:$0xff]  ;;  %v44_v1 = vld [vmem:[%s250_s1 + $0x70] sm:$0xff]  ;;  %v43_v2 = vld [vmem:[%s250_s1 + $0x68] sm:$0xff] }
   0x2   :  { %107 = vmatpush.msra.mxu2 %v45_v0  ;;  %108 = vmatpush.msra.mxu3 %v45_v0  ;;  %v42_v3 = vld [vmem:[%s250_s1 + $0x60] sm:$0xff]  ;;  %v41_v4 = vld [vmem:[%s250_s1 + $0x58] sm:$0xff]  ;;  %v40_v5 = vld [vmem:[%s250_s1 + $0x50] sm:$0xff] }
   0x3   :  { %46 = vmatpush.msra.mxu0 %v45_v0  ;;  %106 = vmatpush.msra.mxu1 %v45_v0  ;;  %v39_v6 = vld [vmem:[%s250_s1 + $0x48] sm:$0xff]  ;;  %v38_v7 = vld [vmem:[%s250_s1 + $0x40] sm:$0xff]  ;;  %v37_v8 = vld [vmem:[%s250_s1 + $0x38] sm:$0xff] }
   0x4   :  { %110 = vmatpush.msra.mxu2 %v44_v1  ;;  %111 = vmatpush.msra.mxu3 %v44_v1  ;;  %v36_v9 = vld [vmem:[%s250_s1 + $0x30] sm:$0xff]  ;;  %v35_v10 = vld [vmem:[%s250_s1 + $0x28] sm:$0xff]  ;;  %v34_v11 = vld [vmem:[%s250_s1 + $0x20] sm:$0xff] }
   0x5   :  { %47 = vmatpush.msra.mxu0 %v44_v1  ;;  %109 = vmatpush.msra.mxu1 %v44_v1  ;;  %v33_v12 = vld [vmem:[%s250_s1 + $0x18] sm:$0xff]  ;;  %v32_v13 = vld [vmem:[%s250_s1 + $0x10] sm:$0xff]  ;;  %v31_v14 = vld [vmem:[%s250_s1 + $0x8] sm:$0xff] }
   0x6   :  { %113 = vmatpush.msra.mxu2 %v43_v2  ;;  %114 = vmatpush.msra.mxu3 %v43_v2  ;;  %v30_v15 = vld [vmem:[%s250_s1] sm:$0xff]  ;;  %v28_v16 = vld [vmem:[%s252_s0 + $0x10] sm:$0xff]  ;;  %v29_v17 = vld [vmem:[%s252_s0 + $0x18] sm:$0xff] }
   0x7   :  { %48 = vmatpush.msra.mxu0 %v43_v2  ;;  %112 = vmatpush.msra.mxu1 %v43_v2  ;;  %v26_v18 = vld [vmem:[%s252_s0] sm:$0xff]  ;;  %v27_v19 = vld [vmem:[%s252_s0 + $0x8] sm:$0xff] }
   0x8   :  { %116 = vmatpush.msra.mxu2 %v42_v3  ;;  %117 = vmatpush.msra.mxu3 %v42_v3  ;;  %v154_v20 = vld [vmem:[%s251_s2] ss:$0 sm:$0xff] }
   0x9   :  { %49 = vmatpush.msra.mxu0 %v42_v3  ;;  %115 = vmatpush.msra.mxu1 %v42_v3 }
   0xa   :  { %119 = vmatpush.msra.mxu2 %v41_v4  ;;  %120 = vmatpush.msra.mxu3 %v41_v4 }
   0xb   :  { %50 = vmatpush.msra.mxu0 %v41_v4  ;;  %118 = vmatpush.msra.mxu1 %v41_v4 }
   0xc   :  { %122 = vmatpush.msra.mxu2 %v40_v5  ;;  %123 = vmatpush.msra.mxu3 %v40_v5 }
   0xd   :  { %51 = vmatpush.msra.mxu0 %v40_v5  ;;  %121 = vmatpush.msra.mxu1 %v40_v5 }
   0xe   :  { %125 = vmatpush.msra.mxu2 %v39_v6  ;;  %126 = vmatpush.msra.mxu3 %v39_v6 }
   0xf   :  { %52 = vmatpush.msra.mxu0 %v39_v6  ;;  %124 = vmatpush.msra.mxu1 %v39_v6 }
  0x10   :  { %128 = vmatpush.msra.mxu2 %v38_v7  ;;  %129 = vmatpush.msra.mxu3 %v38_v7 }
  0x11   :  { %53 = vmatpush.msra.mxu0 %v38_v7  ;;  %127 = vmatpush.msra.mxu1 %v38_v7 }
  0x12   :  { %131 = vmatpush.msra.mxu2 %v37_v8  ;;  %132 = vmatpush.msra.mxu3 %v37_v8 }
  0x13   :  { %54 = vmatpush.msra.mxu0 %v37_v8  ;;  %130 = vmatpush.msra.mxu1 %v37_v8 }
  0x14   :  { %134 = vmatpush.msra.mxu2 %v36_v9  ;;  %135 = vmatpush.msra.mxu3 %v36_v9 }
  0x15   :  { %55 = vmatpush.msra.mxu0 %v36_v9  ;;  %133 = vmatpush.msra.mxu1 %v36_v9 }
  0x16   :  { %137 = vmatpush.msra.mxu2 %v35_v10  ;;  %138 = vmatpush.msra.mxu3 %v35_v10 }
  0x17   :  { %56 = vmatpush.msra.mxu0 %v35_v10  ;;  %136 = vmatpush.msra.mxu1 %v35_v10 }
  0x18   :  { %140 = vmatpush.msra.mxu2 %v34_v11  ;;  %141 = vmatpush.msra.mxu3 %v34_v11 }
  0x19   :  { %57 = vmatpush.msra.mxu0 %v34_v11  ;;  %139 = vmatpush.msra.mxu1 %v34_v11 }
  0x1a   :  { %143 = vmatpush.msra.mxu2 %v33_v12  ;;  %144 = vmatpush.msra.mxu3 %v33_v12 }
  0x1b   :  { %58 = vmatpush.msra.mxu0 %v33_v12  ;;  %142 = vmatpush.msra.mxu1 %v33_v12 }
  0x1c   :  { %146 = vmatpush.msra.mxu2 %v32_v13  ;;  %147 = vmatpush.msra.mxu3 %v32_v13 }
  0x1d   :  { %59 = vmatpush.msra.mxu0 %v32_v13  ;;  %145 = vmatpush.msra.mxu1 %v32_v13 }
  0x1e   :  { %149 = vmatpush.msra.mxu2 %v31_v14  ;;  %150 = vmatpush.msra.mxu3 %v31_v14 }
  0x1f   :  { %60 = vmatpush.msra.mxu0 %v31_v14  ;;  %148 = vmatpush.msra.mxu1 %v31_v14 }
  0x20   :  { %152 = vmatpush.msra.mxu2 %v30_v15  ;;  %153 = vmatpush.msra.mxu3 %v30_v15 }
  0x21   :  { %68 = vmatmul.f32.vlgmr.msra.gmra.mxu2 %v28_v16  ;;  %71 = vmatmul.f32.vlgmr.msra.gmra.mxu3 %v29_v17 }
  0x22   :  { %61 = vmatpush.msra.mxu0 %v30_v15  ;;  %151 = vmatpush.msra.mxu1 %v30_v15 }
  0x23   :  { %62 = vmatmul.f32.vlgmr.msra.gmra.mxu0 %v26_v18  ;;  %65 = vmatmul.f32.vlgmr.msra.gmra.mxu1 %v27_v19 }
  0xa0   :  { %v63_v21 = vpop.f32.mrf.mxu0  ;;  %v66_v22 = vpop.f32.mrf.mxu1 }
  0xa1   :  { %v94_v23 = vadd.f32 %v154_v20, %v63_v21  ;;  %v95_v24 = vadd.f32 %v154_v20, %v66_v22 }
  0xa3   :  { %98 = vst [vmem:[%s253_s3] sm:$0xff] %v94_v23 }
  0xa4   :  { %99 = vst [vmem:[%s253_s3 + $0x8] sm:$0xff] %v95_v24  ;;  %v69_v25 = vpop.f32.mrf.mxu2  ;;  %v72_v26 = vpop.f32.mrf.mxu3 }
  0xa5   :  { %v96_v27 = vadd.f32 %v154_v20, %v69_v25  ;;  %v97_v28 = vadd.f32 %v154_v20, %v72_v26 }
  0xa7   :  { %100 = vst [vmem:[%s253_s3 + $0x10] sm:$0xff] %v96_v27 }
  0xa8   :  { %101 = vst [vmem:[%s253_s3 + $0x18] sm:$0xff] %v97_v28 }

// kernel: _lambda_.17
= control target key start
LH: loop header
LB: loop body
LE: loop exit
PB: predicated region body
PF: predicated region fallthrough
CT: control target
= control target key end

     0   :  { %8 = vsyncpa [#allocation4], 0  ;;  %s201_s15 = smov [#allocation3]   ;;  %s202_s17 = smov 128   ;;  %s254_s0 = inlined_call_operand.vmem [shape: f32[32,128], index: 0, kind: input, shape index: {}]   ;;  %s255_s1 = inlined_call_operand.hbm [shape: f32[128,128], index: 1, kind: input, shape index: {}]   ;;  %s256_s2 = inlined_call_operand.vmem [shape: f32[1,128], index: 2, kind: input, shape index: {}]   ;;  %s257_s3 = inlined_call_operand.vmem [shape: f32[32,128], index: 3, kind: output, shape index: {}]  }
   0x1   :  { %s15_s14 = sshll.u32 %s255_s1, 4  ;;  %s17_s16 = sshll.u32 %s201_s15, 4  ;;  %s16_s14 = int_to_ptr.hbm [resolvable:$true] %s15_s14  ;;  %s18_s16 = int_to_ptr.vmem [resolvable:$true] %s17_s16 }
   0x2   :  { %s203_s18 = smov 8  }
   0x3   :  { %23 = dma.hbm_to_vmem [thread:$0]  %s16_s14, 2048, %s18_s16, [#allocation4], %s202_s17, %s202_s17, %s203_s18  }
   0x4   :  { %199 = dma.done.wait [#allocation4], 2048  }
   0x5   :  { %200 = vsyncadd [#allocation4], 4294965248  ;;  %v61_v0 = vld [vmem:[#allocation3 + $0x78] sm:$0xff]  ;;  %v60_v1 = vld [vmem:[#allocation3 + $0x70] sm:$0xff] }
   0x6   :  { %124 = vmatpush.msra.mxu2 %v61_v0  ;;  %125 = vmatpush.msra.mxu3 %v61_v0  ;;  %v59_v2 = vld [vmem:[#allocation3 + $0x68] sm:$0xff]  ;;  %v58_v3 = vld [vmem:[#allocation3 + $0x60] sm:$0xff]  ;;  %v57_v4 = vld [vmem:[#allocation3 + $0x58] sm:$0xff] }
   0x7   :  { %62 = vmatpush.msra.mxu0 %v61_v0  ;;  %123 = vmatpush.msra.mxu1 %v61_v0  ;;  %v56_v5 = vld [vmem:[#allocation3 + $0x50] sm:$0xff]  ;;  %v55_v6 = vld [vmem:[#allocation3 + $0x48] sm:$0xff]  ;;  %v54_v7 = vld [vmem:[#allocation3 + $0x40] sm:$0xff] }
   0x8   :  { %127 = vmatpush.msra.mxu2 %v60_v1  ;;  %128 = vmatpush.msra.mxu3 %v60_v1  ;;  %v53_v8 = vld [vmem:[#allocation3 + $0x38] sm:$0xff]  ;;  %v52_v9 = vld [vmem:[#allocation3 + $0x30] sm:$0xff]  ;;  %v51_v10 = vld [vmem:[#allocation3 + $0x28] sm:$0xff] }
   0x9   :  { %63 = vmatpush.msra.mxu0 %v60_v1  ;;  %126 = vmatpush.msra.mxu1 %v60_v1  ;;  %v50_v11 = vld [vmem:[#allocation3 + $0x20] sm:$0xff]  ;;  %v49_v12 = vld [vmem:[#allocation3 + $0x18] sm:$0xff]  ;;  %v48_v13 = vld [vmem:[#allocation3 + $0x10] sm:$0xff] }
   0xa   :  { %130 = vmatpush.msra.mxu2 %v59_v2  ;;  %131 = vmatpush.msra.mxu3 %v59_v2  ;;  %v47_v14 = vld [vmem:[#allocation3 + $0x8] sm:$0xff]  ;;  %v46_v15 = vld [vmem:[#allocation3] sm:$0xff]  ;;  %v44_v16 = vld [vmem:[%s254_s0 + $0x10] sm:$0xff] }
   0xb   :  { %64 = vmatpush.msra.mxu0 %v59_v2  ;;  %129 = vmatpush.msra.mxu1 %v59_v2  ;;  %v45_v17 = vld [vmem:[%s254_s0 + $0x18] sm:$0xff]  ;;  %v42_v18 = vld [vmem:[%s254_s0] sm:$0xff]  ;;  %v43_v19 = vld [vmem:[%s254_s0 + $0x8] sm:$0xff] }
   0xc   :  { %133 = vmatpush.msra.mxu2 %v58_v3  ;;  %134 = vmatpush.msra.mxu3 %v58_v3  ;;  %v174_v20 = vld [vmem:[%s256_s2] ss:$0 sm:$0xff] }
   0xd   :  { %65 = vmatpush.msra.mxu0 %v58_v3  ;;  %132 = vmatpush.msra.mxu1 %v58_v3 }
   0xe   :  { %136 = vmatpush.msra.mxu2 %v57_v4  ;;  %137 = vmatpush.msra.mxu3 %v57_v4 }
   0xf   :  { %66 = vmatpush.msra.mxu0 %v57_v4  ;;  %135 = vmatpush.msra.mxu1 %v57_v4 }
  0x10   :  { %139 = vmatpush.msra.mxu2 %v56_v5  ;;  %140 = vmatpush.msra.mxu3 %v56_v5 }
  0x11   :  { %67 = vmatpush.msra.mxu0 %v56_v5  ;;  %138 = vmatpush.msra.mxu1 %v56_v5 }
  0x12   :  { %142 = vmatpush.msra.mxu2 %v55_v6  ;;  %143 = vmatpush.msra.mxu3 %v55_v6 }
  0x13   :  { %68 = vmatpush.msra.mxu0 %v55_v6  ;;  %141 = vmatpush.msra.mxu1 %v55_v6 }
  0x14   :  { %145 = vmatpush.msra.mxu2 %v54_v7  ;;  %146 = vmatpush.msra.mxu3 %v54_v7 }
  0x15   :  { %69 = vmatpush.msra.mxu0 %v54_v7  ;;  %144 = vmatpush.msra.mxu1 %v54_v7 }
  0x16   :  { %148 = vmatpush.msra.mxu2 %v53_v8  ;;  %149 = vmatpush.msra.mxu3 %v53_v8 }
  0x17   :  { %70 = vmatpush.msra.mxu0 %v53_v8  ;;  %147 = vmatpush.msra.mxu1 %v53_v8 }
  0x18   :  { %151 = vmatpush.msra.mxu2 %v52_v9  ;;  %152 = vmatpush.msra.mxu3 %v52_v9 }
  0x19   :  { %71 = vmatpush.msra.mxu0 %v52_v9  ;;  %150 = vmatpush.msra.mxu1 %v52_v9 }
  0x1a   :  { %154 = vmatpush.msra.mxu2 %v51_v10  ;;  %155 = vmatpush.msra.mxu3 %v51_v10 }
  0x1b   :  { %72 = vmatpush.msra.mxu0 %v51_v10  ;;  %153 = vmatpush.msra.mxu1 %v51_v10 }
  0x1c   :  { %157 = vmatpush.msra.mxu2 %v50_v11  ;;  %158 = vmatpush.msra.mxu3 %v50_v11 }
  0x1d   :  { %73 = vmatpush.msra.mxu0 %v50_v11  ;;  %156 = vmatpush.msra.mxu1 %v50_v11 }
  0x1e   :  { %160 = vmatpush.msra.mxu2 %v49_v12  ;;  %161 = vmatpush.msra.mxu3 %v49_v12 }
  0x1f   :  { %74 = vmatpush.msra.mxu0 %v49_v12  ;;  %159 = vmatpush.msra.mxu1 %v49_v12 }
  0x20   :  { %163 = vmatpush.msra.mxu2 %v48_v13  ;;  %164 = vmatpush.msra.mxu3 %v48_v13 }
  0x21   :  { %75 = vmatpush.msra.mxu0 %v48_v13  ;;  %162 = vmatpush.msra.mxu1 %v48_v13 }
  0x22   :  { %166 = vmatpush.msra.mxu2 %v47_v14  ;;  %167 = vmatpush.msra.mxu3 %v47_v14 }
  0x23   :  { %76 = vmatpush.msra.mxu0 %v47_v14  ;;  %165 = vmatpush.msra.mxu1 %v47_v14 }
  0x24   :  { %169 = vmatpush.msra.mxu2 %v46_v15  ;;  %170 = vmatpush.msra.mxu3 %v46_v15 }
  0x25   :  { %84 = vmatmul.f32.vlgmr.msra.gmra.mxu2 %v44_v16  ;;  %87 = vmatmul.f32.vlgmr.msra.gmra.mxu3 %v45_v17 }
  0x26   :  { %77 = vmatpush.msra.mxu0 %v46_v15  ;;  %168 = vmatpush.msra.mxu1 %v46_v15 }
  0x27   :  { %78 = vmatmul.f32.vlgmr.msra.gmra.mxu0 %v42_v18  ;;  %81 = vmatmul.f32.vlgmr.msra.gmra.mxu1 %v43_v19 }
  0xa4   :  { %v79_v21 = vpop.f32.mrf.mxu0  ;;  %v82_v22 = vpop.f32.mrf.mxu1 }
  0xa5   :  { %v110_v23 = vadd.f32 %v174_v20, %v79_v21  ;;  %v111_v24 = vadd.f32 %v174_v20, %v82_v22 }
  0xa7   :  { %114 = vst [vmem:[%s257_s3] sm:$0xff] %v110_v23 }
  0xa8   :  { %115 = vst [vmem:[%s257_s3 + $0x8] sm:$0xff] %v111_v24  ;;  %v85_v25 = vpop.f32.mrf.mxu2  ;;  %v88_v26 = vpop.f32.mrf.mxu3 }
  0xa9   :  { %v112_v27 = vadd.f32 %v174_v20, %v85_v25  ;;  %v113_v28 = vadd.f32 %v174_v20, %v88_v26 }
  0xab   :  { %116 = vst [vmem:[%s257_s3 + $0x10] sm:$0xff] %v112_v27 }
  0xac   :  { %117 = vst [vmem:[%s257_s3 + $0x18] sm:$0xff] %v113_v28 }
  0xad   :  { %122 = vsyncpa [#allocation4], 1 }

// kernel: _lambda_.16
= control target key start
LH: loop header
LB: loop body
LE: loop exit
PB: predicated region body
PF: predicated region fallthrough
CT: control target
= control target key end

     0   :  { %8 = vsyncpa [#allocation3], 0  ;;  %s197_s15 = smov [#allocation2]   ;;  %s198_s17 = smov 128   ;;  %s269_s0 = inlined_call_operand.hbm [shape: f32[32,32], index: 0, kind: input, shape index: {}]   ;;  %s270_s1 = inlined_call_operand.vmem [shape: f32[1,32], index: 1, kind: input, shape index: {}]   ;;  %s271_s2 = inlined_call_operand.vmem [shape: f32[1,32], index: 2, kind: input, shape index: {}]   ;;  %s272_s3 = inlined_call_operand.vmem [shape: f32[32,32], index: 3, kind: output, shape index: {}]  }
   0x1   :  { %s13_s14 = sshll.u32 %s269_s0, 4  ;;  %s15_s16 = sshll.u32 %s197_s15, 4  ;;  %s14_s14 = int_to_ptr.hbm [resolvable:$true] %s13_s14  ;;  %s16_s16 = int_to_ptr.vmem [resolvable:$true] %s15_s16 }
   0x2   :  { %s199_s18 = smov 8  }
   0x3   :  { %21 = dma.hbm_to_vmem [thread:$0]  %s14_s14, 512, %s16_s16, [#allocation3], %s198_s17, %s198_s17, %s199_s18  }
   0x4   :  { %195 = dma.done.wait [#allocation3], 512  }
   0x5   :  { %196 = vsyncadd [#allocation3], 4294966784  ;;  %vm34_vm0 = vcmask 261120   ;;  %v32_v0 = vld [vmem:[#allocation2 + $0x10] sm:$0xff]  ;;  %v30_v1 = vld [vmem:[#allocation2] sm:$0xff]  ;;  %v200_v8 = vmov 32.0  }
   0x6   :  { %v41_v2 = vsel %vm34_vm0, %v32_v0, 0.0  ;;  %v35_v3 = vsel %vm34_vm0, %v30_v1, 0.0  ;;  %v33_v4 = vld [vmem:[#allocation2 + $0x18] sm:$0xff]  ;;  %v31_v5 = vld [vmem:[#allocation2 + $0x8] sm:$0xff]  ;;  %161 = vrcp.f32 %v200_v8  ;;  %v159_v61 = vld [vmem:[%s270_s1] ss:$0 sm:$0xff] }
   0x7   :  { %42 = vadd.xlane.f32.xlu1 %v41_v2  ;;  %36 = vadd.xlane.f32.xlu0 %v35_v3  ;;  %v44_v6 = vsel %vm34_vm0, %v33_v4, 0.0  ;;  %v38_v7 = vsel %vm34_vm0, %v31_v5, 0.0  ;;  %v160_v2 = vld [vmem:[%s271_s2] ss:$0 sm:$0xff] }
   0xc   :  { %v162_v9 = vpop.eup %161 }
   0xd   :  { %v48_v10 = vmul.f32 32.0, %v162_v9  ;;  %vm52_vm1 = vweird.f32 %v162_v9 }
   0xf   :  { %45 = vadd.xlane.f32.xlu1 %v44_v6  ;;  %39 = vadd.xlane.f32.xlu0 %v38_v7  ;;  %v49_v11 = vsub.f32 1.0, %v48_v10 }
  0x11   :  { %v50_v12 = vmul.f32 %v162_v9, %v49_v11 }
  0x13   :  { %v51_v13 = vadd.f32 %v162_v9, %v50_v12 }
  0x15   :  { %v53_v14 = vsel %vm52_vm1, %v162_v9, %v51_v13 }
  0x7a   :  { %v43_v15 = vpop.xlane.xlu1 %42  ;;  %v37_v16 = vpop.xlane.xlu0 %36 }
  0x7b   :  { %v56_v17 = vmul.f32 %v53_v14, %v43_v15  ;;  %v54_v18 = vmul.f32 %v53_v14, %v37_v16 }
  0x7d   :  { %v228_v19 = vsub.f32 %v32_v0, %v56_v17  ;;  %v58_v20 = vsub.f32 %v30_v1, %v54_v18 }
  0x7f   :  { %v64_v21 = vmul.f32 %v228_v19, %v228_v19  ;;  %v62_v22 = vmul.f32 %v58_v20, %v58_v20 }
  0x81   :  { %v72_v23 = vsel %vm34_vm0, %v64_v21, 0.0  ;;  %v66_v24 = vsel %vm34_vm0, %v62_v22, 0.0 }
  0x82   :  { %v46_v25 = vpop.xlane.xlu1 %45  ;;  %73 = vadd.xlane.f32.xlu0 %v72_v23  ;;  %67 = vadd.xlane.f32.xlu2 %v66_v24  ;;  %v40_v26 = vpop.xlane.xlu0 %39 }
  0x83   :  { %v57_v27 = vmul.f32 %v53_v14, %v46_v25  ;;  %v55_v28 = vmul.f32 %v53_v14, %v40_v26 }
  0x85   :  { %v234_v29 = vsub.f32 %v33_v4, %v57_v27  ;;  %v236_v30 = vsub.f32 %v31_v5, %v55_v28 }
  0x87   :  { %v65_v31 = vmul.f32 %v234_v29, %v234_v29  ;;  %v63_v32 = vmul.f32 %v236_v30, %v236_v30 }
  0x89   :  { %v75_v33 = vsel %vm34_vm0, %v65_v31, 0.0  ;;  %v69_v34 = vsel %vm34_vm0, %v63_v32, 0.0 }
  0x8a   :  { %76 = vadd.xlane.f32.xlu1 %v75_v33  ;;  %70 = vadd.xlane.f32.xlu2 %v69_v34 }
  0xf5   :  { %v68_v35 = vpop.xlane.xlu2 %67  ;;  %v74_v36 = vpop.xlane.xlu0 %73 }
  0xf6   :  { %v78_v37 = vmul.f32 %v68_v35, %v53_v14  ;;  %v80_v38 = vmul.f32 %v74_v36, %v53_v14 }
  0xf8   :  { %v82_v39 = vadd.f32 1e-05, %v78_v37  ;;  %v84_v40 = vadd.f32 1e-05, %v80_v38 }
  0xfa   :  { %163 = vrsqrt.f32 %v82_v39  ;;  %vm92_vm4 = vweird.f32 %v82_v39  ;;  %vm112_vm6 = vweird.f32 %v84_v40 }
  0xfb   :  { %165 = vrsqrt.f32 %v84_v40 }
  0xfd   :  { %v77_v41 = vpop.xlane.xlu1 %76  ;;  %v71_v42 = vpop.xlane.xlu2 %70 }
  0xfe   :  { %v81_v43 = vmul.f32 %v77_v41, %v53_v14  ;;  %v79_v44 = vmul.f32 %v71_v42, %v53_v14 }
 0x100   :  { %v164_v45 = vpop.eup %163  ;;  %v85_v46 = vadd.f32 1e-05, %v81_v43  ;;  %v83_v47 = vadd.f32 1e-05, %v79_v44 }
 0x101   :  { %v166_v48 = vpop.eup %165  ;;  %v87_v49 = vmul.f32 %v164_v45, %v82_v39  ;;  %vm93_vm2 = vweird.f32 %v164_v45 }
 0x102   :  { %v107_v50 = vmul.f32 %v166_v48, %v84_v40  ;;  %167 = vrsqrt.f32 %v85_v46  ;;  %vm113_vm3 = vweird.f32 %v166_v48  ;;  %vm94_vm5 = vmor %vm92_vm4, %vm93_vm2  ;;  %vm122_vm10 = vweird.f32 %v85_v46 }
 0x103   :  { %v88_v51 = vmul.f32 %v164_v45, %v87_v49  ;;  %169 = vrsqrt.f32 %v83_v47  ;;  %vm114_vm7 = vmor %vm112_vm6, %vm113_vm3  ;;  %vm102_vm12 = vweird.f32 %v83_v47 }
 0x104   :  { %v108_v52 = vmul.f32 %v166_v48, %v107_v50 }
 0x105   :  { %v89_v53 = vmul.f32 0.5, %v88_v51 }
 0x106   :  { %v109_v54 = vmul.f32 0.5, %v108_v52 }
 0x107   :  { %v90_v55 = vsub.f32 1.5, %v89_v53 }
 0x108   :  { %v168_v56 = vpop.eup %167  ;;  %v110_v57 = vsub.f32 1.5, %v109_v54 }
 0x109   :  { %v170_v58 = vpop.eup %169  ;;  %v91_v59 = vmul.f32 %v164_v45, %v90_v55  ;;  %v117_v60 = vmul.f32 %v168_v56, %v85_v46  ;;  %vm123_vm8 = vweird.f32 %v168_v56 }
 0x10a   :  { %v111_v62 = vmul.f32 %v166_v48, %v110_v57  ;;  %v97_v63 = vmul.f32 %v170_v58, %v83_v47  ;;  %vm103_vm9 = vweird.f32 %v170_v58  ;;  %vm124_vm11 = vmor %vm122_vm10, %vm123_vm8 }
 0x10b   :  { %v95_v0 = vsel %vm94_vm5, %v164_v45, %v91_v59  ;;  %v118_v1 = vmul.f32 %v168_v56, %v117_v60  ;;  %vm104_vm13 = vmor %vm102_vm12, %vm103_vm9 }
 0x10c   :  { %v126_v3 = vmul.f32 %v95_v0, %v58_v20  ;;  %v115_v4 = vsel %vm114_vm7, %v166_v48, %v111_v62  ;;  %v98_v5 = vmul.f32 %v170_v58, %v97_v63 }
 0x10d   :  { %v128_v6 = vmul.f32 %v115_v4, %v228_v19  ;;  %v119_v7 = vmul.f32 0.5, %v118_v1 }
 0x10e   :  { %v134_v8 = vmul.f32 %v159_v61, %v126_v3  ;;  %v99_v9 = vmul.f32 0.5, %v98_v5 }
 0x10f   :  { %v136_v10 = vmul.f32 %v159_v61, %v128_v6  ;;  %v120_v11 = vsub.f32 1.5, %v119_v7 }
 0x110   :  { %v142_v12 = vadd.f32 %v160_v2, %v134_v8  ;;  %v100_v13 = vsub.f32 1.5, %v99_v9 }
 0x111   :  { %v144_v14 = vadd.f32 %v160_v2, %v136_v10  ;;  %v121_v15 = vmul.f32 %v168_v56, %v120_v11 }
 0x112   :  { %146 = vst.msk [vmem:[%s272_s3] sm:$0xff] %vm34_vm0, %v142_v12  ;;  %v101_v16 = vmul.f32 %v170_v58, %v100_v13 }
 0x113   :  { %148 = vst.msk [vmem:[%s272_s3 + $0x10] sm:$0xff] %vm34_vm0, %v144_v14  ;;  %v125_v17 = vsel %vm124_vm11, %v168_v56, %v121_v15 }
 0x114   :  { %v129_v18 = vmul.f32 %v125_v17, %v234_v29  ;;  %v105_v19 = vsel %vm104_vm13, %v170_v58, %v101_v16 }
 0x115   :  { %v127_v20 = vmul.f32 %v105_v19, %v236_v30 }
 0x116   :  { %v137_v21 = vmul.f32 %v159_v61, %v129_v18 }
 0x117   :  { %v135_v22 = vmul.f32 %v159_v61, %v127_v20 }
 0x118   :  { %v145_v23 = vadd.f32 %v160_v2, %v137_v21 }
 0x119   :  { %v143_v24 = vadd.f32 %v160_v2, %v135_v22 }
 0x11a   :  { %149 = vst.msk [vmem:[%s272_s3 + $0x18] sm:$0xff] %vm34_vm0, %v145_v23 }
 0x11b   :  { %147 = vst.msk [vmem:[%s272_s3 + $0x8] sm:$0xff] %vm34_vm0, %v143_v24 }
 0x11c   :  { %154 = vsyncpa [#allocation3], 1 }

// kernel: _lambda_.21
= control target key start
LH: loop header
LB: loop body
LE: loop exit
PB: predicated region body
PF: predicated region fallthrough
CT: control target
= control target key end

     0   :  { %s490_s9 = smov 0   ;;  %s492_s10 = smov 0   ;;  %s544_s0 = inlined_call_operand.vmem [shape: f32[2,4,16,8], index: 0, kind: input, shape index: {}]   ;;  %s545_s1 = inlined_call_operand.vmem [shape: f32[2,4,16,8], index: 1, kind: input, shape index: {}]   ;;  %s546_s2 = inlined_call_operand.vmem [shape: f32[2,4,16,16], index: 2, kind: output, shape index: {}]  }
   0x1   :  { %s494_s11 = smov 0   ;;  %s496_s12 = smov 0  }
   0x2   :  { %s498_s13 = smov 0  }
   0x3 LB: > { %s21_s14 = sadd.s32 1, %s465_s11  ;;  %s24_s15 = sadd.s32 1, %s469_s12  ;;  %s473_s13 = sphi %s498_s13, %s12_s13   ;;  %s469_s12 = sphi %s496_s12, %s550_s12   ;;  %s465_s11 = sphi %s494_s11, %s549_s11   ;;  %s461_s10 = sphi %s492_s10, %s548_s10   ;;  %s457_s9 = sphi %s490_s9, %s547_s9  }
   0x4   : > { %p22_p0 = scmp.ge.s32.totalorder %s21_s14, 4  ;;  %p377_p1 = scmp.ge.s32.totalorder %s473_s13, 1 }
   0x5   : > { %p148_p2 = scmp.lt.s32.totalorder %s473_s13, 9 }
   0x6   : > { %s552_s14 = smov (%p22_p0, %s21_s14), 0  ;;  %s554_s15 = smov (!%p22_p0, %s24_s15), %s469_s12 }
   0x7   : > { %p149_p3 = pnand %p377_p1, %p148_p2  ;;  %p26_p4 = scmp.ge.s32.totalorder %s554_s15, 2 }
   0x8   : > { %p187_p5 = scmp.lt.s32.totalorder (!%p149_p3), %s461_s10, 1  ;;  %p189_p6 = scmp.lt.s32.totalorder (!%p149_p3), %s457_s9, 3 }
   0x9   : > { %s556_s15 = smov (%p26_p4, %s554_s15), 0  ;;  %152 = sbr.rel (%p149_p3) target bundleno = 155 (0x9b), region = 28 }
   0xe   : > { %s558_s10 = smov (!%p187_p5, %s461_s10), 1  ;;  %s560_s9 = smov (!%p189_p6, %s457_s9), 3  ;;  %vm218_vm0 = vcmask 64512   ;;  %vm254_vm1 = vcmask 130048  }
   0xf   : > { %s379_s16 = sshll.u32 %s558_s10, 3  ;;  %s378_s17 = sshll.u32 %s560_s9, 1 }
  0x10   : > { %s193_s18 = sadd.s32 %s379_s16, %s378_s17 }
  0x11   : > { %s380_s19 = sshll.u32 %s193_s18, 3 }
  0x12   : > { %s204_s22 = scalar_lea.vmem %s545_s1, %s380_s19  ;;  %s195_s25 = scalar_lea.vmem %s544_s0, %s380_s19 }
  0x13   : > { %v217_v0 = vld [vmem:[%s204_s22 + $0x8] sm:$0xff]  ;;  %v216_v1 = vld [vmem:[%s204_s22] sm:$0xff]  ;;  %s213_s28 = scalar_lea.vmem %s546_s2, %s380_s19 }
  0x14   : > { %387 = vmatpush.xpose.msk.msra.mxu0 %vm218_vm0, %v217_v0  ;;  %393 = vmatpush.xpose.msk.msra.mxu1 %vm218_vm0, %v217_v0  ;;  %v214_v2 = vld [vmem:[%s195_s25] sm:$0xff]  ;;  %v215_v3 = vld [vmem:[%s195_s25 + $0x8] sm:$0xff] }
  0x18   : > { %388 = vmatpush.xpose.msk.msra.mxu0 %vm218_vm0, %v216_v1  ;;  %394 = vmatpush.xpose.msk.msra.mxu1 %vm218_vm0, %v216_v1 }
  0x1b   : > { %389 = vmatmul.msk.f32.vlgmr.msra.gmra.mxu0 %vm218_vm0, %v214_v2  ;;  %390 = vmatmul.msk.f32.vlgmr.msra.gmra.mxu1 %vm218_vm0, %v215_v3 }
  0x98   : > { %v248_v4 = vpop.f32.mrf.mxu0  ;;  %v251_v5 = vpop.f32.mrf.mxu1 }
  0x99   : > { %255 = vst.msk [vmem:[%s213_s28] sm:$0xff] %vm254_vm1, %v248_v4 }
  0x9a   : > { %256 = vst.msk [vmem:[%s213_s28 + $0x8] sm:$0xff] %vm254_vm1, %v251_v5 }
  0x9b PF: > { %s12_s13 = sadd.s32 1, %s473_s13   ;;  %s547_s9 = smov %s465_s11 }
  0x9c   : > { %p9_p7 = scmp.ge.s32.totalorder %s12_s13, 10   ;;  %s548_s10 = smov %s469_s12 }
  0x9d   : > { %s549_s11 = smov %s552_s14  ;;  %s550_s12 = smov %s556_s15 }
  0x9e   :  { %11 = sbr.rel (!%p9_p7) target bundleno = 3 (0x3), region = 61 }

// kernel: _lambda_.22
= control target key start
LH: loop header
LB: loop body
LE: loop exit
PB: predicated region body
PF: predicated region fallthrough
CT: control target
= control target key end

     0   :  { %s765_s15 = smov 0   ;;  %s767_s16 = smov 0   ;;  %s846_s0 = inlined_call_operand.vmem [shape: f32[2,4,16,8], index: 0, kind: input, shape index: {}]   ;;  %s847_s1 = inlined_call_operand.vmem [shape: f32[2,4,16,8], index: 1, kind: input, shape index: {}]   ;;  %s848_s2 = inlined_call_operand.vmem [shape: f32[2,4,16,16], index: 2, kind: input, shape index: {}]   ;;  %s849_s3 = inlined_call_operand.vmem [shape: f32[2,4,16,8], index: 3, kind: input, shape index: {}]   ;;  %s850_s4 = inlined_call_operand.vmem [shape: f32[2,4,16,8], index: 4, kind: output, shape index: {}]  }
   0x1   :  { %s769_s17 = smov 0   ;;  %s771_s18 = smov 0  }
   0x2   :  { %s773_s19 = smov 0  }
   0x3 LB: > { %s23_s20 = sadd.s32 1, %s730_s17  ;;  %s26_s21 = sadd.s32 1, %s734_s18  ;;  %s738_s19 = sphi %s773_s19, %s14_s19   ;;  %s734_s18 = sphi %s771_s18, %s854_s18   ;;  %s730_s17 = sphi %s769_s17, %s853_s17   ;;  %s726_s16 = sphi %s767_s16, %s852_s16   ;;  %s722_s15 = sphi %s765_s15, %s851_s15  }
   0x4   : > { %p24_p0 = scmp.ge.s32.totalorder %s23_s20, 4  ;;  %p624_p1 = scmp.ge.s32.totalorder %s738_s19, 1 }
   0x5   : > { %p230_p2 = scmp.lt.s32.totalorder %s738_s19, 9 }
   0x6   : > { %s856_s20 = smov (%p24_p0, %s23_s20), 0  ;;  %s858_s21 = smov (!%p24_p0, %s26_s21), %s734_s18 }
   0x7   : > { %p231_p3 = pnand %p624_p1, %p230_p2  ;;  %p28_p4 = scmp.ge.s32.totalorder %s858_s21, 2 }
   0x8   : > { %p291_p5 = scmp.lt.s32.totalorder (!%p231_p3), %s726_s16, 1  ;;  %p293_p6 = scmp.lt.s32.totalorder (!%p231_p3), %s722_s15, 3 }
   0x9   : > { %s860_s21 = smov (%p28_p4, %s858_s21), 0  ;;  %234 = sbr.rel (%p231_p3) target bundleno = 562 (0x232), region = 36 }
   0xe   : > { %s862_s16 = smov (!%p291_p5, %s726_s16), 1  ;;  %s864_s15 = smov (!%p293_p6, %s722_s15), 3  ;;  %vm342_vm0 = vcmask 64512   ;;  %vm380_vm1 = vcmask 130048  }
   0xf   : > { %s626_s22 = sshll.u32 %s862_s16, 3  ;;  %s625_s23 = sshll.u32 %s864_s15, 1 }
  0x10   : > { %s297_s24 = sadd.s32 %s626_s22, %s625_s23 }
  0x11   : > { %s795_s25 = sshll.u32 %s297_s24, 3 }
  0x12   : > { %s308_s28 = scalar_lea.vmem %s847_s1, %s795_s25  ;;  %s299_s5 = scalar_lea.vmem %s846_s0, %s795_s25 }
  0x13   : > { %v339_v0 = vld [vmem:[%s308_s28 + $0x8] sm:$0xff]  ;;  %v338_v1 = vld [vmem:[%s308_s28] sm:$0xff]  ;;  %s317_s8 = scalar_lea.vmem %s848_s2, %s795_s25  ;;  %s326_s11 = scalar_lea.vmem %s849_s3, %s795_s25 }
  0x14   : > { %648 = vmatpush.xpose.msk.msra.mxu2 %vm342_vm0, %v339_v0  ;;  %640 = vmatpush.xpose.msk.msra.mxu0 %vm342_vm0, %v339_v0  ;;  %v337_v2 = vld [vmem:[%s299_s5 + $0x8] sm:$0xff]  ;;  %v336_v3 = vld [vmem:[%s299_s5] sm:$0xff]  ;;  %s335_s14 = scalar_lea.vmem %s850_s4, %s795_s25 }
  0x15   : > { %v341_v4 = vld [vmem:[%s317_s8 + $0x8] sm:$0xff]  ;;  %v340_v6 = vld [vmem:[%s317_s8] sm:$0xff] }
  0x16   : > { %v430_v24 = vld [vmem:[%s326_s11 + $0x8] sm:$0xff]  ;;  %v429_v25 = vld [vmem:[%s326_s11] sm:$0xff] }
  0x17   : > { %650 = vmatpush.msra.mxu3 %v430_v24  ;;  %451 = vmatpush.msra.mxu1 %v430_v24 }
  0x18   : > { %649 = vmatpush.xpose.msk.msra.mxu2 %vm342_vm0, %v338_v1  ;;  %641 = vmatpush.xpose.msk.msra.mxu0 %vm342_vm0, %v338_v1 }
  0x19   : > { %651 = vmatpush.msra.mxu3 %v429_v25  ;;  %452 = vmatpush.msra.mxu1 %v429_v25 }
  0x1b   : > { %643 = vmatmul.msk.f32.vlgmr.msra.gmra.mxu2 %vm342_vm0, %v337_v2  ;;  %642 = vmatmul.msk.f32.vlgmr.msra.gmra.mxu0 %vm342_vm0, %v336_v3 }
  0x98   : > { %v372_v7 = vpop.f32.mrf.mxu0 }
  0x99   : > { %v373_v10 = vadd.f32 %v372_v7, %v340_v6 }
  0x9b   : > { %v378_v12 = vmul.f32 0.17677669, %v373_v10 }
  0x9d   : > { %v381_v13 = vsel %vm380_vm1, %v378_v12, -inf }
  0x9e   : > { %v375_v5 = vpop.f32.mrf.mxu2 }
  0x9f   : > { %v376_v8 = vadd.f32 %v375_v5, %v341_v4 }
  0xa1   : > { %v379_v9 = vmul.f32 0.17677669, %v376_v8 }
  0xa3   : > { %v384_v11 = vsel %vm380_vm1, %v379_v9, -inf }
  0xa4   : > { %385 = vmax.xlane.f32.xlu0 %v384_v11 }
  0xac   : > { %382 = vmax.xlane.f32.xlu0 %v381_v13 }
 0x117   : > { %v386_v14 = vpop.xlane.xlu0 %385 }
 0x118   : > { %v388_v15 = vsub.f32 %v379_v9, %v386_v14 }
 0x11a   : > { %v391_v16 = vmul.f32 1.442695, %v388_v15 }
 0x11c   : > { %692 = vpow2.f32 %v391_v16 }
 0x11f   : > { %v383_v17 = vpop.xlane.xlu0 %382 }
 0x120   : > { %v387_v18 = vsub.f32 %v378_v12, %v383_v17 }
 0x122   : > { %v693_v19 = vpop.eup %692  ;;  %v389_v20 = vmul.f32 1.442695, %v387_v18 }
 0x123   : > { %v396_v21 = vsel %vm380_vm1, %v693_v19, 0.0 }
 0x124   : > { %694 = vpow2.f32 %v389_v20  ;;  %397 = vadd.xlane.f32.xlu1 %v396_v21 }
 0x12a   : > { %v695_v22 = vpop.eup %694 }
 0x12b   : > { %v393_v23 = vsel %vm380_vm1, %v695_v22, 0.0 }
 0x12c   : > { %394 = vadd.xlane.f32.xlu1 %v393_v23 }
 0x197   : > { %v398_v26 = vpop.xlane.xlu1 %397 }
 0x198   : > { %696 = vrcp.f32 %v398_v26  ;;  %v425_v31 = vand.u32 2147483648, %v398_v26  ;;  %v423_v33 = vand.u32 2147483647, %v398_v26  ;;  %vm419_vm3 = vweird.f32 %v398_v26 }
 0x19a   : > { %v426_v36 = vor.u32 1.1754944e-38, %v425_v31  ;;  %vm424_vm5 = vcmp.eq.f32.partialorder %v423_v33, 8.507059e+37 }
 0x19e   : > { %v697_v27 = vpop.eup %696 }
 0x19f   : > { %v415_v28 = vmul.f32 %v697_v27, %v398_v26  ;;  %v395_v29 = vpop.xlane.xlu1 %394  ;;  %vm420_vm2 = vweird.f32 %v697_v27 }
 0x1a0   : > { %698 = vrcp.f32 %v395_v29  ;;  %vm421_vm4 = vmor %vm419_vm3, %vm420_vm2  ;;  %v410_v42 = vand.u32 2147483648, %v395_v29  ;;  %v408_v44 = vand.u32 2147483647, %v395_v29  ;;  %vm404_vm7 = vweird.f32 %v395_v29 }
 0x1a1   : > { %v416_v30 = vsub.f32 1.0, %v415_v28 }
 0x1a2   : > { %v411_v46 = vor.u32 1.1754944e-38, %v410_v42  ;;  %vm409_vm9 = vcmp.eq.f32.partialorder %v408_v44, 8.507059e+37 }
 0x1a3   : > { %v417_v32 = vmul.f32 %v697_v27, %v416_v30 }
 0x1a5   : > { %v418_v34 = vadd.f32 %v697_v27, %v417_v32 }
 0x1a6   : > { %v699_v35 = vpop.eup %698 }
 0x1a7   : > { %v400_v37 = vmul.f32 %v699_v35, %v395_v29  ;;  %v422_v38 = vsel %vm421_vm4, %v697_v27, %v418_v34  ;;  %vm405_vm6 = vweird.f32 %v699_v35 }
 0x1a8   : > { %v427_v39 = vsel %vm424_vm5, %v426_v36, %v422_v38  ;;  %vm406_vm8 = vmor %vm404_vm7, %vm405_vm6 }
 0x1a9   : > { %v401_v40 = vsub.f32 1.0, %v400_v37  ;;  %v428_v41 = vmul.f32 %v693_v19, %v427_v39 }
 0x1ab   : > { %v402_v43 = vmul.f32 %v699_v35, %v401_v40  ;;  %645 = vmatmul.msk.f32.vlgmr.msra.gmra.mxu3 %vm380_vm1, %v428_v41 }
 0x1ad   : > { %v403_v45 = vadd.f32 %v699_v35, %v402_v43 }
 0x1af   : > { %v407_v47 = vsel %vm406_vm8, %v699_v35, %v403_v45 }
 0x1b0   : > { %v412_v48 = vsel %vm409_vm9, %v411_v46, %v407_v47 }
 0x1b1   : > { %v413_v49 = vmul.f32 %v695_v22, %v412_v48 }
 0x1b3   : > { %644 = vmatmul.msk.f32.vlgmr.msra.gmra.mxu1 %vm380_vm1, %v413_v49 }
 0x22e   : > { %v457_v50 = vpop.f32.mrf.mxu3 }
 0x22f   : > { %461 = vst.msk [vmem:[%s335_s14 + $0x8] sm:$0xff] %vm342_vm0, %v457_v50 }
 0x230   : > { %v454_v51 = vpop.f32.mrf.mxu1 }
 0x231   : > { %460 = vst.msk [vmem:[%s335_s14] sm:$0xff] %vm342_vm0, %v454_v51 }
 0x232 PF: > { %s14_s19 = sadd.s32 1, %s738_s19   ;;  %s851_s15 = smov %s730_s17 }
 0x233   : > { %p11_p7 = scmp.ge.s32.totalorder %s14_s19, 10   ;;  %s852_s16 = smov %s734_s18 }
 0x234   : > { %s853_s17 = smov %s856_s20  ;;  %s854_s18 = smov %s860_s21 }
 0x235   :  { %13 = sbr.rel (!%p11_p7) target bundleno = 3 (0x3), region = 75 }

// kernel: _lambda_.25
= control target key start
LH: loop header
LB: loop body
LE: loop exit
PB: predicated region body
PF: predicated region fallthrough
CT: control target
= control target key end

     0   :  { %s365_s1 = inlined_call_operand.vmem [shape: f32[128,128], index: 1, kind: input, shape index: {}]   ;;  %s366_s2 = inlined_call_operand.vmem [shape: f32[1,128], index: 2, kind: input, shape index: {}]   ;;  %s367_s0 = inlined_call_operand.vmem [shape: f32[32,128], index: 0, kind: input, shape index: {}]   ;;  %s368_s3 = inlined_call_operand.vmem [shape: f32[32,128], index: 3, kind: output, shape index: {}]  }
   0x1   :  { %v45_v0 = vld [vmem:[%s365_s1 + $0x78] sm:$0xff]  ;;  %v44_v1 = vld [vmem:[%s365_s1 + $0x70] sm:$0xff]  ;;  %v43_v2 = vld [vmem:[%s365_s1 + $0x68] sm:$0xff] }
   0x2   :  { %46 = vmatpush.msra.mxu0 %v45_v0  ;;  %190 = vmatpush.msra.mxu1 %v45_v0  ;;  %v42_v3 = vld [vmem:[%s365_s1 + $0x60] sm:$0xff]  ;;  %v41_v4 = vld [vmem:[%s365_s1 + $0x58] sm:$0xff]  ;;  %v40_v5 = vld [vmem:[%s365_s1 + $0x50] sm:$0xff] }
   0x3   :  { %191 = vmatpush.msra.mxu2 %v45_v0  ;;  %192 = vmatpush.msra.mxu3 %v45_v0  ;;  %v39_v6 = vld [vmem:[%s365_s1 + $0x48] sm:$0xff]  ;;  %v38_v7 = vld [vmem:[%s365_s1 + $0x40] sm:$0xff]  ;;  %v37_v8 = vld [vmem:[%s365_s1 + $0x38] sm:$0xff] }
   0x4   :  { %47 = vmatpush.msra.mxu0 %v44_v1  ;;  %193 = vmatpush.msra.mxu1 %v44_v1  ;;  %v36_v9 = vld [vmem:[%s365_s1 + $0x30] sm:$0xff]  ;;  %v35_v10 = vld [vmem:[%s365_s1 + $0x28] sm:$0xff]  ;;  %v34_v11 = vld [vmem:[%s365_s1 + $0x20] sm:$0xff] }
   0x5   :  { %194 = vmatpush.msra.mxu2 %v44_v1  ;;  %195 = vmatpush.msra.mxu3 %v44_v1  ;;  %v33_v12 = vld [vmem:[%s365_s1 + $0x18] sm:$0xff]  ;;  %v32_v13 = vld [vmem:[%s365_s1 + $0x10] sm:$0xff]  ;;  %v31_v14 = vld [vmem:[%s365_s1 + $0x8] sm:$0xff] }
   0x6   :  { %48 = vmatpush.msra.mxu0 %v43_v2  ;;  %196 = vmatpush.msra.mxu1 %v43_v2  ;;  %v30_v15 = vld [vmem:[%s365_s1] sm:$0xff]  ;;  %v27_v17 = vld [vmem:[%s367_s0 + $0x8] sm:$0xff]  ;;  %v28_v18 = vld [vmem:[%s367_s0 + $0x10] sm:$0xff] }
   0x7   :  { %197 = vmatpush.msra.mxu2 %v43_v2  ;;  %198 = vmatpush.msra.mxu3 %v43_v2  ;;  %v26_v16 = vld [vmem:[%s367_s0] sm:$0xff]  ;;  %v29_v19 = vld [vmem:[%s367_s0 + $0x18] sm:$0xff] }
   0x8   :  { %49 = vmatpush.msra.mxu0 %v42_v3  ;;  %199 = vmatpush.msra.mxu1 %v42_v3  ;;  %v238_v20 = vld [vmem:[%s366_s2] ss:$0 sm:$0xff] }
   0x9   :  { %200 = vmatpush.msra.mxu2 %v42_v3  ;;  %201 = vmatpush.msra.mxu3 %v42_v3 }
   0xa   :  { %50 = vmatpush.msra.mxu0 %v41_v4  ;;  %202 = vmatpush.msra.mxu1 %v41_v4 }
   0xb   :  { %203 = vmatpush.msra.mxu2 %v41_v4  ;;  %204 = vmatpush.msra.mxu3 %v41_v4 }
   0xc   :  { %51 = vmatpush.msra.mxu0 %v40_v5  ;;  %205 = vmatpush.msra.mxu1 %v40_v5 }
   0xd   :  { %206 = vmatpush.msra.mxu2 %v40_v5  ;;  %207 = vmatpush.msra.mxu3 %v40_v5 }
   0xe   :  { %52 = vmatpush.msra.mxu0 %v39_v6  ;;  %208 = vmatpush.msra.mxu1 %v39_v6 }
   0xf   :  { %209 = vmatpush.msra.mxu2 %v39_v6  ;;  %210 = vmatpush.msra.mxu3 %v39_v6 }
  0x10   :  { %53 = vmatpush.msra.mxu0 %v38_v7  ;;  %211 = vmatpush.msra.mxu1 %v38_v7 }
  0x11   :  { %212 = vmatpush.msra.mxu2 %v38_v7  ;;  %213 = vmatpush.msra.mxu3 %v38_v7 }
  0x12   :  { %54 = vmatpush.msra.mxu0 %v37_v8  ;;  %214 = vmatpush.msra.mxu1 %v37_v8 }
  0x13   :  { %215 = vmatpush.msra.mxu2 %v37_v8  ;;  %216 = vmatpush.msra.mxu3 %v37_v8 }
  0x14   :  { %55 = vmatpush.msra.mxu0 %v36_v9  ;;  %217 = vmatpush.msra.mxu1 %v36_v9 }
  0x15   :  { %218 = vmatpush.msra.mxu2 %v36_v9  ;;  %219 = vmatpush.msra.mxu3 %v36_v9 }
  0x16   :  { %56 = vmatpush.msra.mxu0 %v35_v10  ;;  %220 = vmatpush.msra.mxu1 %v35_v10 }
  0x17   :  { %221 = vmatpush.msra.mxu2 %v35_v10  ;;  %222 = vmatpush.msra.mxu3 %v35_v10 }
  0x18   :  { %57 = vmatpush.msra.mxu0 %v34_v11  ;;  %223 = vmatpush.msra.mxu1 %v34_v11 }
  0x19   :  { %224 = vmatpush.msra.mxu2 %v34_v11  ;;  %225 = vmatpush.msra.mxu3 %v34_v11 }
  0x1a   :  { %58 = vmatpush.msra.mxu0 %v33_v12  ;;  %226 = vmatpush.msra.mxu1 %v33_v12 }
  0x1b   :  { %227 = vmatpush.msra.mxu2 %v33_v12  ;;  %228 = vmatpush.msra.mxu3 %v33_v12 }
  0x1c   :  { %59 = vmatpush.msra.mxu0 %v32_v13  ;;  %229 = vmatpush.msra.mxu1 %v32_v13 }
  0x1d   :  { %230 = vmatpush.msra.mxu2 %v32_v13  ;;  %231 = vmatpush.msra.mxu3 %v32_v13 }
  0x1e   :  { %60 = vmatpush.msra.mxu0 %v31_v14  ;;  %232 = vmatpush.msra.mxu1 %v31_v14 }
  0x1f   :  { %233 = vmatpush.msra.mxu2 %v31_v14  ;;  %234 = vmatpush.msra.mxu3 %v31_v14 }
  0x20   :  { %61 = vmatpush.msra.mxu0 %v30_v15  ;;  %235 = vmatpush.msra.mxu1 %v30_v15 }
  0x21   :  { %236 = vmatpush.msra.mxu2 %v30_v15  ;;  %237 = vmatpush.msra.mxu3 %v30_v15 }
  0x22   :  { %62 = vmatmul.f32.vlgmr.msra.gmra.mxu0 %v26_v16  ;;  %65 = vmatmul.f32.vlgmr.msra.gmra.mxu1 %v27_v17 }
  0x23   :  { %68 = vmatmul.f32.vlgmr.msra.gmra.mxu2 %v28_v18  ;;  %71 = vmatmul.f32.vlgmr.msra.gmra.mxu3 %v29_v19 }
  0x9f   :  { %v63_v21 = vpop.f32.mrf.mxu0  ;;  %v66_v22 = vpop.f32.mrf.mxu1 }
  0xa0   :  { %v94_v23 = vadd.f32 %v238_v20, %v63_v21  ;;  %v95_v24 = vadd.f32 %v238_v20, %v66_v22 }
  0xa2   :  { %v186_v25 = vmul.f32 -1.442695, %v94_v23  ;;  %v187_v26 = vmul.f32 -1.442695, %v95_v24 }
  0xa4   :  { %239 = vpow2.f32 %v186_v25 }
  0xa5   :  { %241 = vpow2.f32 %v187_v26 }
  0xa6   :  { %v69_v27 = vpop.f32.mrf.mxu2  ;;  %v72_v28 = vpop.f32.mrf.mxu3 }
  0xa7   :  { %v338_v29 = vadd.f32 %v238_v20, %v69_v27  ;;  %v340_v30 = vadd.f32 %v238_v20, %v72_v28 }
  0xa9   :  { %v188_v31 = vmul.f32 -1.442695, %v338_v29  ;;  %v189_v32 = vmul.f32 -1.442695, %v340_v30 }
  0xaa   :  { %v240_v33 = vpop.eup %239 }
  0xab   :  { %v242_v34 = vpop.eup %241  ;;  %v110_v35 = vadd.f32 1.0, %v240_v33  ;;  %243 = vpow2.f32 %v188_v31 }
  0xac   :  { %v111_v36 = vadd.f32 1.0, %v242_v34  ;;  %245 = vpow2.f32 %v189_v32 }
  0xad   :  { %247 = vrcp.f32 %v110_v35  ;;  %vm119_vm0 = vweird.f32 %v110_v35  ;;  %v123_v46 = vand.u32 2147483647, %v110_v35  ;;  %v125_v47 = vand.u32 2147483648, %v110_v35 }
  0xae   :  { %249 = vrcp.f32 %v111_v36  ;;  %v138_v50 = vand.u32 2147483647, %v111_v36  ;;  %v140_v51 = vand.u32 2147483648, %v111_v36  ;;  %vm134_vm2 = vweird.f32 %v111_v36 }
  0xaf   :  { %v126_v55 = vor.u32 1.1754944e-38, %v125_v47  ;;  %vm124_vm5 = vcmp.eq.f32.partialorder %v123_v46, 8.507059e+37 }
  0xb0   :  { %vm139_vm7 = vcmp.eq.f32.partialorder %v138_v50, 8.507059e+37  ;;  %v141_v60 = vor.u32 1.1754944e-38, %v140_v51 }
  0xb1   :  { %v244_v37 = vpop.eup %243 }
  0xb2   :  { %v246_v38 = vpop.eup %245  ;;  %v112_v39 = vadd.f32 1.0, %v244_v37 }
  0xb3   :  { %v248_v40 = vpop.eup %247  ;;  %v344_v41 = vadd.f32 1.0, %v246_v38 }
  0xb4   :  { %v250_v42 = vpop.eup %249  ;;  %v115_v43 = vmul.f32 %v248_v40, %v110_v35  ;;  %251 = vrcp.f32 %v112_v39  ;;  %vm120_vm1 = vweird.f32 %v248_v40  ;;  %v153_v3 = vand.u32 2147483647, %v112_v39 }
  0xb5   :  { %v130_v44 = vmul.f32 %v250_v42, %v111_v36  ;;  %253 = vrcp.f32 %v344_v41  ;;  %vm135_vm3 = vweird.f32 %v250_v42  ;;  %vm121_vm4 = vmor %vm119_vm0, %vm120_vm1  ;;  %v155_v4 = vand.u32 2147483648, %v112_v39 }
  0xb6   :  { %v116_v45 = vsub.f32 1.0, %v115_v43  ;;  %vm136_vm6 = vmor %vm134_vm2, %vm135_vm3  ;;  %vm149_vm9 = vweird.f32 %v112_v39  ;;  %v170_v8 = vand.u32 2147483648, %v344_v41  ;;  %v168_v11 = vand.u32 2147483647, %v344_v41 }
  0xb7   :  { %v131_v48 = vsub.f32 1.0, %v130_v44  ;;  %v156_v12 = vor.u32 1.1754944e-38, %v155_v4  ;;  %vm154_vm12 = vcmp.eq.f32.partialorder %v153_v3, 8.507059e+37  ;;  %vm164_vm13 = vweird.f32 %v344_v41 }
  0xb8   :  { %v117_v49 = vmul.f32 %v248_v40, %v116_v45  ;;  %v171_v16 = vor.u32 1.1754944e-38, %v170_v8  ;;  %vm169_vm15 = vcmp.eq.f32.partialorder %v168_v11, 8.507059e+37 }
  0xb9   :  { %v132_v52 = vmul.f32 %v250_v42, %v131_v48 }
  0xba   :  { %v252_v53 = vpop.eup %251  ;;  %v118_v54 = vadd.f32 %v248_v40, %v117_v49 }
  0xbb   :  { %v133_v56 = vadd.f32 %v250_v42, %v132_v52  ;;  %v145_v57 = vmul.f32 %v252_v53, %v112_v39  ;;  %v254_v58 = vpop.eup %253  ;;  %vm150_vm8 = vweird.f32 %v252_v53 }
  0xbc   :  { %v122_v59 = vsel %vm121_vm4, %v248_v40, %v118_v54  ;;  %v160_v0 = vmul.f32 %v254_v58, %v344_v41  ;;  %vm165_vm10 = vweird.f32 %v254_v58  ;;  %vm151_vm11 = vmor %vm149_vm9, %vm150_vm8 }
  0xbd   :  { %v127_v61 = vsel %vm124_vm5, %v126_v55, %v122_v59  ;;  %v137_v62 = vsel %vm136_vm6, %v250_v42, %v133_v56  ;;  %v146_v63 = vsub.f32 1.0, %v145_v57  ;;  %vm166_vm14 = vmor %vm164_vm13, %vm165_vm10 }
  0xbe   :  { %v174_v1 = vmul.f32 %v127_v61, %v94_v23  ;;  %v142_v2 = vsel %vm139_vm7, %v141_v60, %v137_v62  ;;  %v161_v7 = vsub.f32 1.0, %v160_v0 }
  0xbf   :  { %v175_v5 = vmul.f32 %v142_v2, %v95_v24  ;;  %v147_v6 = vmul.f32 %v252_v53, %v146_v63 }
  0xc0   :  { %178 = vst [vmem:[%s368_s3] sm:$0xff] %v174_v1  ;;  %v162_v10 = vmul.f32 %v254_v58, %v161_v7 }
  0xc1   :  { %179 = vst [vmem:[%s368_s3 + $0x8] sm:$0xff] %v175_v5  ;;  %v148_v9 = vadd.f32 %v252_v53, %v147_v6 }
  0xc2   :  { %v163_v14 = vadd.f32 %v254_v58, %v162_v10 }
  0xc3   :  { %v152_v13 = vsel %vm151_vm11, %v252_v53, %v148_v9 }
  0xc4   :  { %v157_v15 = vsel %vm154_vm12, %v156_v12, %v152_v13  ;;  %v167_v18 = vsel %vm166_vm14, %v254_v58, %v163_v14 }
  0xc5   :  { %v176_v17 = vmul.f32 %v157_v15, %v338_v29  ;;  %v172_v19 = vsel %vm169_vm15, %v171_v16, %v167_v18 }
  0xc6   :  { %v177_v20 = vmul.f32 %v172_v19, %v340_v30 }
  0xc7   :  { %180 = vst [vmem:[%s368_s3 + $0x10] sm:$0xff] %v176_v17 }
  0xc8   :  { %181 = vst [vmem:[%s368_s3 + $0x18] sm:$0xff] %v177_v20 }

// kernel: _lambda_.24
= control target key start
LH: loop header
LB: loop body
LE: loop exit
PB: predicated region body
PF: predicated region fallthrough
CT: control target
= control target key end

     0   :  { %vm18_vm0 = vcmask 261120   ;;  %v151_v8 = vmov 32.0   ;;  %s229_s0 = inlined_call_operand.vmem [shape: f32[32,32], index: 0, kind: input, shape index: {}]   ;;  %s230_s1 = inlined_call_operand.vmem [shape: f32[1,32], index: 1, kind: input, shape index: {}]   ;;  %s231_s2 = inlined_call_operand.vmem [shape: f32[1,32], index: 2, kind: input, shape index: {}]   ;;  %s232_s3 = inlined_call_operand.vmem [shape: f32[32,32], index: 3, kind: output, shape index: {}]  }
   0x1   :  { %v16_v0 = vld [vmem:[%s229_s0 + $0x10] sm:$0xff]  ;;  %v14_v1 = vld [vmem:[%s229_s0] sm:$0xff]  ;;  %v17_v4 = vld [vmem:[%s229_s0 + $0x18] sm:$0xff]  ;;  %141 = vrcp.f32 %v151_v8 }
   0x2   :  { %v25_v2 = vsel %vm18_vm0, %v16_v0, 0.0  ;;  %v19_v3 = vsel %vm18_vm0, %v14_v1, 0.0  ;;  %v15_v5 = vld [vmem:[%s229_s0 + $0x8] sm:$0xff]  ;;  %v28_v6 = vsel %vm18_vm0, %v17_v4, 0.0  ;;  %v139_v61 = vld [vmem:[%s230_s1] ss:$0 sm:$0xff] }
   0x3   :  { %26 = vadd.xlane.f32.xlu1 %v25_v2  ;;  %20 = vadd.xlane.f32.xlu0 %v19_v3  ;;  %v22_v7 = vsel %vm18_vm0, %v15_v5, 0.0  ;;  %v140_v2 = vld [vmem:[%s231_s2] ss:$0 sm:$0xff] }
   0x7   :  { %v142_v9 = vpop.eup %141 }
   0x8   :  { %v32_v10 = vmul.f32 32.0, %v142_v9  ;;  %vm36_vm1 = vweird.f32 %v142_v9 }
   0xa   :  { %v33_v11 = vsub.f32 1.0, %v32_v10 }
   0xb   :  { %29 = vadd.xlane.f32.xlu1 %v28_v6  ;;  %23 = vadd.xlane.f32.xlu0 %v22_v7 }
   0xc   :  { %v34_v12 = vmul.f32 %v142_v9, %v33_v11 }
   0xe   :  { %v35_v13 = vadd.f32 %v142_v9, %v34_v12 }
  0x10   :  { %v37_v14 = vsel %vm36_vm1, %v142_v9, %v35_v13 }
  0x76   :  { %v27_v15 = vpop.xlane.xlu1 %26  ;;  %v21_v16 = vpop.xlane.xlu0 %20 }
  0x77   :  { %v40_v17 = vmul.f32 %v37_v14, %v27_v15  ;;  %v38_v18 = vmul.f32 %v37_v14, %v21_v16 }
  0x79   :  { %v188_v19 = vsub.f32 %v16_v0, %v40_v17  ;;  %v42_v20 = vsub.f32 %v14_v1, %v38_v18 }
  0x7b   :  { %v48_v21 = vmul.f32 %v188_v19, %v188_v19  ;;  %v46_v22 = vmul.f32 %v42_v20, %v42_v20 }
  0x7d   :  { %v56_v23 = vsel %vm18_vm0, %v48_v21, 0.0  ;;  %v50_v24 = vsel %vm18_vm0, %v46_v22, 0.0 }
  0x7e   :  { %v30_v25 = vpop.xlane.xlu1 %29  ;;  %57 = vadd.xlane.f32.xlu0 %v56_v23  ;;  %51 = vadd.xlane.f32.xlu2 %v50_v24  ;;  %v24_v26 = vpop.xlane.xlu0 %23 }
  0x7f   :  { %v41_v27 = vmul.f32 %v37_v14, %v30_v25  ;;  %v39_v28 = vmul.f32 %v37_v14, %v24_v26 }
  0x81   :  { %v194_v29 = vsub.f32 %v17_v4, %v41_v27  ;;  %v196_v30 = vsub.f32 %v15_v5, %v39_v28 }
  0x83   :  { %v49_v31 = vmul.f32 %v194_v29, %v194_v29  ;;  %v47_v32 = vmul.f32 %v196_v30, %v196_v30 }
  0x85   :  { %v59_v33 = vsel %vm18_vm0, %v49_v31, 0.0  ;;  %v53_v34 = vsel %vm18_vm0, %v47_v32, 0.0 }
  0x86   :  { %60 = vadd.xlane.f32.xlu1 %v59_v33  ;;  %54 = vadd.xlane.f32.xlu2 %v53_v34 }
  0xf1   :  { %v52_v35 = vpop.xlane.xlu2 %51  ;;  %v58_v36 = vpop.xlane.xlu0 %57 }
  0xf2   :  { %v62_v37 = vmul.f32 %v52_v35, %v37_v14  ;;  %v64_v38 = vmul.f32 %v58_v36, %v37_v14 }
  0xf4   :  { %v66_v39 = vadd.f32 1e-05, %v62_v37  ;;  %v68_v40 = vadd.f32 1e-05, %v64_v38 }
  0xf6   :  { %143 = vrsqrt.f32 %v66_v39  ;;  %vm76_vm4 = vweird.f32 %v66_v39  ;;  %vm96_vm6 = vweird.f32 %v68_v40 }
  0xf7   :  { %145 = vrsqrt.f32 %v68_v40 }
  0xf9   :  { %v61_v41 = vpop.xlane.xlu1 %60  ;;  %v55_v42 = vpop.xlane.xlu2 %54 }
  0xfa   :  { %v65_v43 = vmul.f32 %v61_v41, %v37_v14  ;;  %v63_v44 = vmul.f32 %v55_v42, %v37_v14 }
  0xfc   :  { %v144_v45 = vpop.eup %143  ;;  %v69_v46 = vadd.f32 1e-05, %v65_v43  ;;  %v67_v47 = vadd.f32 1e-05, %v63_v44 }
  0xfd   :  { %v146_v48 = vpop.eup %145  ;;  %v71_v49 = vmul.f32 %v144_v45, %v66_v39  ;;  %vm77_vm2 = vweird.f32 %v144_v45 }
  0xfe   :  { %v91_v50 = vmul.f32 %v146_v48, %v68_v40  ;;  %147 = vrsqrt.f32 %v69_v46  ;;  %vm97_vm3 = vweird.f32 %v146_v48  ;;  %vm78_vm5 = vmor %vm76_vm4, %vm77_vm2  ;;  %vm106_vm10 = vweird.f32 %v69_v46 }
  0xff   :  { %v72_v51 = vmul.f32 %v144_v45, %v71_v49  ;;  %149 = vrsqrt.f32 %v67_v47  ;;  %vm98_vm7 = vmor %vm96_vm6, %vm97_vm3  ;;  %vm86_vm12 = vweird.f32 %v67_v47 }
 0x100   :  { %v92_v52 = vmul.f32 %v146_v48, %v91_v50 }
 0x101   :  { %v73_v53 = vmul.f32 0.5, %v72_v51 }
 0x102   :  { %v93_v54 = vmul.f32 0.5, %v92_v52 }
 0x103   :  { %v74_v55 = vsub.f32 1.5, %v73_v53 }
 0x104   :  { %v148_v56 = vpop.eup %147  ;;  %v94_v57 = vsub.f32 1.5, %v93_v54 }
 0x105   :  { %v150_v58 = vpop.eup %149  ;;  %v75_v59 = vmul.f32 %v144_v45, %v74_v55  ;;  %v101_v60 = vmul.f32 %v148_v56, %v69_v46  ;;  %vm107_vm8 = vweird.f32 %v148_v56 }
 0x106   :  { %v95_v62 = vmul.f32 %v146_v48, %v94_v57  ;;  %v81_v63 = vmul.f32 %v150_v58, %v67_v47  ;;  %vm87_vm9 = vweird.f32 %v150_v58  ;;  %vm108_vm11 = vmor %vm106_vm10, %vm107_vm8 }
 0x107   :  { %v79_v0 = vsel %vm78_vm5, %v144_v45, %v75_v59  ;;  %v102_v1 = vmul.f32 %v148_v56, %v101_v60  ;;  %vm88_vm13 = vmor %vm86_vm12, %vm87_vm9 }
 0x108   :  { %v110_v3 = vmul.f32 %v79_v0, %v42_v20  ;;  %v99_v4 = vsel %vm98_vm7, %v146_v48, %v95_v62  ;;  %v82_v5 = vmul.f32 %v150_v58, %v81_v63 }
 0x109   :  { %v112_v6 = vmul.f32 %v99_v4, %v188_v19  ;;  %v103_v7 = vmul.f32 0.5, %v102_v1 }
 0x10a   :  { %v118_v8 = vmul.f32 %v139_v61, %v110_v3  ;;  %v83_v9 = vmul.f32 0.5, %v82_v5 }
 0x10b   :  { %v120_v10 = vmul.f32 %v139_v61, %v112_v6  ;;  %v104_v11 = vsub.f32 1.5, %v103_v7 }
 0x10c   :  { %v126_v12 = vadd.f32 %v140_v2, %v118_v8  ;;  %v84_v13 = vsub.f32 1.5, %v83_v9 }
 0x10d   :  { %v128_v14 = vadd.f32 %v140_v2, %v120_v10  ;;  %v105_v15 = vmul.f32 %v148_v56, %v104_v11 }
 0x10e   :  { %130 = vst.msk [vmem:[%s232_s3] sm:$0xff] %vm18_vm0, %v126_v12  ;;  %v85_v16 = vmul.f32 %v150_v58, %v84_v13 }
 0x10f   :  { %132 = vst.msk [vmem:[%s232_s3 + $0x10] sm:$0xff] %vm18_vm0, %v128_v14  ;;  %v109_v17 = vsel %vm108_vm11, %v148_v56, %v105_v15 }
 0x110   :  { %v113_v18 = vmul.f32 %v109_v17, %v194_v29  ;;  %v89_v19 = vsel %vm88_vm13, %v150_v58, %v85_v16 }
 0x111   :  { %v111_v20 = vmul.f32 %v89_v19, %v196_v30 }
 0x112   :  { %v121_v21 = vmul.f32 %v139_v61, %v113_v18 }
 0x113   :  { %v119_v22 = vmul.f32 %v139_v61, %v111_v20 }
 0x114   :  { %v129_v23 = vadd.f32 %v140_v2, %v121_v21 }
 0x115   :  { %v127_v24 = vadd.f32 %v140_v2, %v119_v22 }
 0x116   :  { %133 = vst.msk [vmem:[%s232_s3 + $0x18] sm:$0xff] %vm18_vm0, %v129_v23 }
 0x117   :  { %131 = vst.msk [vmem:[%s232_s3 + $0x8] sm:$0xff] %vm18_vm0, %v127_v24 }

// kernel: _lambda_.27
= control target key start
LH: loop header
LB: loop body
LE: loop exit
PB: predicated region body
PF: predicated region fallthrough
CT: control target
= control target key end

     0   :  { %s265_s1 = inlined_call_operand.vmem [shape: f32[32,32], index: 1, kind: input, shape index: {}]   ;;  %s266_s2 = inlined_call_operand.vmem [shape: f32[1,32], index: 2, kind: input, shape index: {}]   ;;  %s267_s3 = inlined_call_operand.vmem [shape: f32[1,32], index: 3, kind: input, shape index: {}]   ;;  %s268_s0 = inlined_call_operand.vmem [shape: f32[32,32], index: 0, kind: input, shape index: {}]   ;;  %s269_s4 = inlined_call_operand.vmem [shape: f32[32,32], index: 4, kind: output, shape index: {}]  }
   0x1   :  { %v21_v0 = vld [vmem:[%s265_s1] sm:$0xff]  ;;  %v22_v2 = vld [vmem:[%s265_s1 + $0x8] sm:$0xff]  ;;  %v23_v4 = vld [vmem:[%s265_s1 + $0x10] sm:$0xff] }
   0x2   :  { %v130_v1 = vmul.f32 -1.442695, %v21_v0  ;;  %v131_v3 = vmul.f32 -1.442695, %v22_v2  ;;  %v132_v5 = vmul.f32 -1.442695, %v23_v4 }
   0x3   :  { %v24_v6 = vld [vmem:[%s265_s1 + $0x18] sm:$0xff]  ;;  %v17_v39 = vld [vmem:[%s268_s0] sm:$0xff]  ;;  %v18_v56 = vld [vmem:[%s268_s0 + $0x8] sm:$0xff] }
   0x4   :  { %136 = vpow2.f32 %v130_v1  ;;  %v133_v7 = vmul.f32 -1.442695, %v24_v6  ;;  %v134_v44 = vld [vmem:[%s266_s2] ss:$0 sm:$0xff]  ;;  %v19_v61 = vld [vmem:[%s268_s0 + $0x10] sm:$0xff]  ;;  %v20_v2 = vld [vmem:[%s268_s0 + $0x18] sm:$0xff] }
   0x5   :  { %138 = vpow2.f32 %v131_v3  ;;  %v135_v55 = vld [vmem:[%s267_s3] ss:$0 sm:$0xff] }
   0x6   :  { %140 = vpow2.f32 %v132_v5 }
   0x7   :  { %142 = vpow2.f32 %v133_v7 }
   0xa   :  { %v137_v8 = vpop.eup %136 }
   0xb   :  { %v37_v9 = vadd.f32 1.0, %v137_v8  ;;  %v139_v10 = vpop.eup %138 }
   0xc   :  { %v141_v11 = vpop.eup %140  ;;  %v38_v13 = vadd.f32 1.0, %v139_v10 }
   0xd   :  { %144 = vrcp.f32 %v37_v9  ;;  %v143_v12 = vpop.eup %142  ;;  %v39_v14 = vadd.f32 1.0, %v141_v11  ;;  %v50_v16 = vand.u32 2147483647, %v37_v9  ;;  %v52_v17 = vand.u32 2147483648, %v37_v9 }
   0xe   :  { %v40_v15 = vadd.f32 1.0, %v143_v12  ;;  %146 = vrcp.f32 %v38_v13  ;;  %vm46_vm0 = vweird.f32 %v37_v9  ;;  %vm61_vm3 = vweird.f32 %v38_v13 }
   0xf   :  { %148 = vrcp.f32 %v39_v14  ;;  %vm189_vm1 = vcmp.eq.f32.partialorder %v50_v16, 8.507059e+37  ;;  %v53_v23 = vor.u32 1.1754944e-38, %v52_v17  ;;  %v65_v26 = vand.u32 2147483647, %v38_v13 }
  0x10   :  { %150 = vrcp.f32 %v40_v15  ;;  %v67_v27 = vand.u32 2147483648, %v38_v13  ;;  %vm76_vm4 = vweird.f32 %v39_v14  ;;  %v80_v31 = vand.u32 2147483647, %v39_v14 }
  0x11   :  { %v82_v32 = vand.u32 2147483648, %v39_v14  ;;  %vm91_vm7 = vweird.f32 %v40_v15  ;;  %v97_v38 = vand.u32 2147483648, %v40_v15  ;;  %v95_v42 = vand.u32 2147483647, %v40_v15 }
  0x12   :  { %vm211_vm11 = vcmp.eq.f32.partialorder %v65_v26, 8.507059e+37  ;;  %v68_v47 = vor.u32 1.1754944e-38, %v67_v27  ;;  %vm81_vm13 = vcmp.eq.f32.partialorder %v80_v31, 8.507059e+37 }
  0x13   :  { %v145_v18 = vpop.eup %144  ;;  %v83_v52 = vor.u32 1.1754944e-38, %v82_v32  ;;  %v98_v59 = vor.u32 1.1754944e-38, %v97_v38  ;;  %vm96_vm15 = vcmp.eq.f32.partialorder %v95_v42, 8.507059e+37 }
  0x14   :  { %v42_v19 = vmul.f32 %v145_v18, %v37_v9  ;;  %v147_v21 = vpop.eup %146  ;;  %vm47_vm2 = vweird.f32 %v145_v18 }
  0x15   :  { %v149_v24 = vpop.eup %148  ;;  %v57_v25 = vmul.f32 %v147_v21, %v38_v13  ;;  %vm194_vm5 = vmor %vm46_vm0, %vm47_vm2  ;;  %vm62_vm6 = vweird.f32 %v147_v21  ;;  %vm121_vm0 = vcmask 261120  }
  0x16   :  { %v43_v22 = vsub.f32 1.0, %v42_v19  ;;  %v151_v28 = vpop.eup %150  ;;  %v72_v30 = vmul.f32 %v149_v24, %v39_v14  ;;  %vm77_vm8 = vweird.f32 %v149_v24  ;;  %vm207_vm10 = vmor %vm61_vm3, %vm62_vm6 }
  0x17   :  { %v58_v34 = vsub.f32 1.0, %v57_v25  ;;  %v87_v35 = vmul.f32 %v151_v28, %v40_v15  ;;  %vm92_vm9 = vweird.f32 %v151_v28  ;;  %vm219_vm12 = vmor %vm76_vm4, %vm77_vm8 }
  0x18   :  { %v44_v29 = vmul.f32 %v145_v18, %v43_v22  ;;  %v73_v37 = vsub.f32 1.0, %v72_v30  ;;  %vm231_vm14 = vmor %vm91_vm7, %vm92_vm9 }
  0x19   :  { %v59_v40 = vmul.f32 %v147_v21, %v58_v34  ;;  %v88_v41 = vsub.f32 1.0, %v87_v35 }
  0x1a   :  { %v45_v36 = vadd.f32 %v145_v18, %v44_v29  ;;  %v74_v48 = vmul.f32 %v149_v24, %v73_v37 }
  0x1b   :  { %v60_v50 = vadd.f32 %v147_v21, %v59_v40  ;;  %v89_v53 = vmul.f32 %v151_v28, %v88_v41 }
  0x1c   :  { %v49_v43 = vsel %vm194_vm5, %v145_v18, %v45_v36  ;;  %v75_v57 = vadd.f32 %v149_v24, %v74_v48 }
  0x1d   :  { %v54_v49 = vsel %vm189_vm1, %v53_v23, %v49_v43  ;;  %v64_v60 = vsel %vm207_vm10, %v147_v21, %v60_v50  ;;  %v90_v62 = vadd.f32 %v151_v28, %v89_v53 }
  0x1e   :  { %v101_v54 = vmul.f32 %v54_v49, %v17_v39  ;;  %v69_v0 = vsel %vm211_vm11, %v68_v47, %v64_v60  ;;  %v79_v1 = vsel %vm219_vm12, %v149_v24, %v75_v57 }
  0x1f   :  { %v102_v3 = vmul.f32 %v69_v0, %v18_v56  ;;  %v84_v4 = vsel %vm81_vm13, %v83_v52, %v79_v1  ;;  %v94_v5 = vsel %vm231_vm14, %v151_v28, %v90_v62 }
  0x20   :  { %v109_v63 = vmul.f32 %v134_v44, %v101_v54  ;;  %v103_v7 = vmul.f32 %v84_v4, %v19_v61  ;;  %v99_v8 = vsel %vm96_vm15, %v98_v59, %v94_v5 }
  0x21   :  { %v110_v9 = vmul.f32 %v134_v44, %v102_v3  ;;  %v104_v10 = vmul.f32 %v99_v8, %v20_v2 }
  0x22   :  { %v117_v6 = vadd.f32 %v135_v55, %v109_v63  ;;  %v111_v11 = vmul.f32 %v134_v44, %v103_v7 }
  0x23   :  { %v118_v12 = vadd.f32 %v135_v55, %v110_v9  ;;  %v112_v13 = vmul.f32 %v134_v44, %v104_v10 }
  0x24   :  { %122 = vst.msk [vmem:[%s269_s4] sm:$0xff] %vm121_vm0, %v117_v6  ;;  %v119_v14 = vadd.f32 %v135_v55, %v111_v11 }
  0x25   :  { %123 = vst.msk [vmem:[%s269_s4 + $0x8] sm:$0xff] %vm121_vm0, %v118_v12  ;;  %v120_v15 = vadd.f32 %v135_v55, %v112_v13 }
  0x26   :  { %124 = vst.msk [vmem:[%s269_s4 + $0x10] sm:$0xff] %vm121_vm0, %v119_v14 }
  0x27   :  { %125 = vst.msk [vmem:[%s269_s4 + $0x18] sm:$0xff] %vm121_vm0, %v120_v15 }

// kernel: _lambda_.26
= control target key start
LH: loop header
LB: loop body
LE: loop exit
PB: predicated region body
PF: predicated region fallthrough
CT: control target
= control target key end

     0   :  { %s689_s12 = smov 0   ;;  %s691_s13 = smov 0   ;;  %s815_s0 = inlined_call_operand.vmem [shape: f32[32,512], index: 0, kind: input, shape index: {}]   ;;  %s816_s1 = inlined_call_operand.vmem [shape: f32[512,128], index: 1, kind: input, shape index: {}]   ;;  %s817_s2 = inlined_call_operand.vmem [shape: f32[1,128], index: 2, kind: input, shape index: {}]   ;;  %s818_s3 = inlined_call_operand.vmem [shape: f32[32,128], index: 3, kind: output, shape index: {}]  }
   0x1   :  { %s693_s14 = smov 0   ;;  %s695_s15 = smov 0  }
   0x2   :  { %s697_s16 = smov 0  }
   0x3 LB: > { %s25_s17 = sadd.s32 1, %s662_s15  ;;  %p48_p1 = scmp.ne.s32.totalorder %s654_s13, %s650_s12  ;;  %s666_s16 = sphi %s697_s16, %s13_s16   ;;  %s662_s15 = sphi %s695_s15, %s822_s15   ;;  %s658_s14 = sphi %s693_s14, %s821_s14   ;;  %s654_s13 = sphi %s691_s13, %s820_s13   ;;  %s650_s12 = sphi %s689_s12, %s819_s12  }
   0x4   : > { %p26_p0 = scmp.ge.s32.totalorder %s25_s17, 2  ;;  %p49_p2 = scmp.eq.s32.totalorder %s666_s16, 0 }
   0x5   : > { %s41_s19 = sadd.s32 1, %s654_s13  ;;  %p539_p5 = scmp.ge.s32.totalorder %s666_s16, 2 }
   0x6   : > { %s824_s17 = smov (%p26_p0, %s25_s17), 0  ;;  %p50_p3 = por %p49_p2, %p48_p1 }
   0x7   : > { %s37_s18 = ssub.s32 %s662_s15, %s824_s17  ;;  %162 = sbr.rel (%p539_p5) target bundleno = 24 (0x18), region = 20 }
   0x8   : > { %p39_p4 = scmp.eq.s32.totalorder %s37_s18, 0 }
   0xa   : > { %s724_s20 = scalar_select %p39_p4, %s654_s13, %s41_s19  }
   0xc   : > { %165 = sbr.rel (!%p50_p3) target bundleno = 24 (0x18), region = 24  ;;  %s167_s21 = sand.u32 (%p50_p3), 1, %s654_s13  }
   0xd   : > { %s553_s22 = sshll.u32 (%p50_p3), %s662_s15, 4  ;;  %s540_s23 = sshll.u32 (%p50_p3), %s167_s21, 6 }
   0xe   : > { %s175_s26 = scalar_lea.vmem (%p50_p3), %s815_s0, %s553_s22  ;;  %s169_s27 = scalar_lea.vmem (%p50_p3), [#allocation3], %s540_s23 }
   0xf   : > { %v188_v0 = vld [vmem:[%s175_s26] sm:$0xff] (%p50_p3)  ;;  %v190_v1 = vld [vmem:[%s175_s26 + $0x8] sm:$0xff] (%p50_p3) }
  0x10   : > { %v192_v2 = vld [vmem:[%s175_s26 + $0x20] sm:$0xff] (%p50_p3)  ;;  %189 = vst [vmem:[%s169_s27] sm:$0xff] (%p50_p3), %v188_v0  ;;  %v194_v3 = vld [vmem:[%s175_s26 + $0x28] sm:$0xff] (%p50_p3) }
  0x11   : > { %191 = vst [vmem:[%s169_s27 + $0x8] sm:$0xff] %v190_v1  ;;  %v196_v4 = vld [vmem:[%s175_s26 + $0x40] sm:$0xff]  ;;  %v198_v5 = vld [vmem:[%s175_s26 + $0x48] sm:$0xff] }
  0x12   : > { %193 = vst [vmem:[%s169_s27 + $0x10] sm:$0xff] %v192_v2  ;;  %v200_v6 = vld [vmem:[%s175_s26 + $0x60] sm:$0xff]  ;;  %v202_v7 = vld [vmem:[%s175_s26 + $0x68] sm:$0xff] }
  0x13   : > { %195 = vst [vmem:[%s169_s27 + $0x18] sm:$0xff] %v194_v3 }
  0x14   : > { %197 = vst [vmem:[%s169_s27 + $0x20] sm:$0xff] %v196_v4 }
  0x15   : > { %199 = vst [vmem:[%s169_s27 + $0x28] sm:$0xff] %v198_v5 }
  0x16   : > { %201 = vst [vmem:[%s169_s27 + $0x30] sm:$0xff] %v200_v6 }
  0x17   : > { %203 = vst [vmem:[%s169_s27 + $0x38] sm:$0xff] %v202_v7 }
  0x18 PF: > { %p543_p6 = scmp.ge.s32.totalorder %s666_s16, 1  ;;  %p220_p7 = scmp.lt.s32.totalorder %s666_s16, 3 }
  0x1a   : > { %p221_p8 = pnand %p543_p6, %p220_p7 }
  0x1b   : > { %s227_s28 = sand.u32 (!%p221_p8), 1, %s650_s12   ;;  %s545_s29 = sshll.u32 (!%p221_p8), %s658_s14, 5 }
  0x1c   : > { %224 = sbr.rel (%p221_p8) target bundleno = 231 (0xe7), region = 51  ;;  %s544_s30 = sshll.u32 (!%p221_p8), %s227_s28, 6 }
  0x1d   : > { %p267_p9 = scmp.lt.s32.totalorder (!%p221_p8), %s545_s29, 63  ;;  %s741_s8 = scalar_lea.vmem (!%p221_p8), [#allocation3], %s544_s30 }
  0x1e   : > { %p547_p10 = scmp.ne.s32.totalorder (!%p221_p8), %s658_s14, 0 }
  0x21   : > { %s826_s29 = smov (!%p267_p9, %s545_s29), 63  ;;  %290 = sbr.rel (%p547_p10) target bundleno = 43 (0x2b), region = 59 }
  0x22   : > { %s546_s4 = sshll.u32 %s826_s29, 3 }
  0x23   : > { %s739_s7 = scalar_lea.vmem %s816_s1, %s546_s4 }
  0x26   : > { %v668_v8 = vmov 0.0  }
  0x27   : > { %291 = vst [vmem:[#allocation2 + $0x10] sm:$0xff] %v668_v8 }
  0x28   : > { %292 = vst [vmem:[#allocation2] sm:$0xff] %v668_v8 }
  0x29   : > { %293 = vst [vmem:[#allocation2 + $0x18] sm:$0xff] %v668_v8 }
  0x2a   : > { %294 = vst [vmem:[#allocation2 + $0x8] sm:$0xff] %v668_v8 }
  0x2b PF: > { %v322_v9 = vld [vmem:[%s739_s7 + $0x78] sm:$0xff]  ;;  %v321_v11 = vld [vmem:[%s739_s7 + $0x70] sm:$0xff]  ;;  %v320_v13 = vld [vmem:[%s739_s7 + $0x68] sm:$0xff]  ;;  %p548_p11 = scmp.ne.s32.totalorder %s658_s14, 1 }
  0x2c   : > { %v338_v10 = vld [vmem:[%s739_s7 + $0xf8] sm:$0xff]  ;;  %554 = vmatpush.msra.mxu2 %v322_v9  ;;  %v337_v12 = vld [vmem:[%s739_s7 + $0xf0] sm:$0xff]  ;;  %v336_v14 = vld [vmem:[%s739_s7 + $0xe8] sm:$0xff]  ;;  %339 = vmatpush.msra.mxu0 %v322_v9 }
  0x2d   : > { %570 = vmatpush.msra.mxu3 %v338_v10  ;;  %368 = vmatpush.msra.mxu1 %v338_v10  ;;  %v319_v15 = vld [vmem:[%s739_s7 + $0x60] sm:$0xff]  ;;  %v318_v17 = vld [vmem:[%s739_s7 + $0x58] sm:$0xff]  ;;  %v317_v19 = vld [vmem:[%s739_s7 + $0x50] sm:$0xff] }
  0x2e   : > { %555 = vmatpush.msra.mxu2 %v321_v11  ;;  %v335_v16 = vld [vmem:[%s739_s7 + $0xe0] sm:$0xff]  ;;  %340 = vmatpush.msra.mxu0 %v321_v11  ;;  %v334_v18 = vld [vmem:[%s739_s7 + $0xd8] sm:$0xff]  ;;  %v333_v20 = vld [vmem:[%s739_s7 + $0xd0] sm:$0xff] }
  0x2f   : > { %571 = vmatpush.msra.mxu3 %v337_v12  ;;  %369 = vmatpush.msra.mxu1 %v337_v12  ;;  %v316_v21 = vld [vmem:[%s739_s7 + $0x48] sm:$0xff]  ;;  %v315_v23 = vld [vmem:[%s739_s7 + $0x40] sm:$0xff]  ;;  %v314_v25 = vld [vmem:[%s739_s7 + $0x38] sm:$0xff] }
  0x30   : > { %556 = vmatpush.msra.mxu2 %v320_v13  ;;  %341 = vmatpush.msra.mxu0 %v320_v13  ;;  %v332_v22 = vld [vmem:[%s739_s7 + $0xc8] sm:$0xff]  ;;  %v331_v24 = vld [vmem:[%s739_s7 + $0xc0] sm:$0xff]  ;;  %v330_v26 = vld [vmem:[%s739_s7 + $0xb8] sm:$0xff] }
  0x31   : > { %572 = vmatpush.msra.mxu3 %v336_v14  ;;  %370 = vmatpush.msra.mxu1 %v336_v14  ;;  %v313_v27 = vld [vmem:[%s739_s7 + $0x30] sm:$0xff]  ;;  %v312_v29 = vld [vmem:[%s739_s7 + $0x28] sm:$0xff]  ;;  %v311_v31 = vld [vmem:[%s739_s7 + $0x20] sm:$0xff] }
  0x32   : > { %557 = vmatpush.msra.mxu2 %v319_v15  ;;  %342 = vmatpush.msra.mxu0 %v319_v15  ;;  %v329_v28 = vld [vmem:[%s739_s7 + $0xb0] sm:$0xff]  ;;  %v328_v30 = vld [vmem:[%s739_s7 + $0xa8] sm:$0xff]  ;;  %v327_v32 = vld [vmem:[%s739_s7 + $0xa0] sm:$0xff] }
  0x33   : > { %573 = vmatpush.msra.mxu3 %v335_v16  ;;  %371 = vmatpush.msra.mxu1 %v335_v16  ;;  %v310_v33 = vld [vmem:[%s739_s7 + $0x18] sm:$0xff]  ;;  %v309_v35 = vld [vmem:[%s739_s7 + $0x10] sm:$0xff]  ;;  %v308_v37 = vld [vmem:[%s739_s7 + $0x8] sm:$0xff] }
  0x34   : > { %558 = vmatpush.msra.mxu2 %v318_v17  ;;  %343 = vmatpush.msra.mxu0 %v318_v17  ;;  %v326_v34 = vld [vmem:[%s739_s7 + $0x98] sm:$0xff]  ;;  %v325_v36 = vld [vmem:[%s739_s7 + $0x90] sm:$0xff]  ;;  %v324_v38 = vld [vmem:[%s739_s7 + $0x88] sm:$0xff] }
  0x35   : > { %574 = vmatpush.msra.mxu3 %v334_v18  ;;  %372 = vmatpush.msra.mxu1 %v334_v18  ;;  %v307_v39 = vld [vmem:[%s739_s7] sm:$0xff]  ;;  %v304_v42 = vld [vmem:[%s741_s8 + $0x28] sm:$0xff]  ;;  %v305_v45 = vld [vmem:[%s741_s8 + $0x30] sm:$0xff] }
  0x36   : > { %559 = vmatpush.msra.mxu2 %v317_v19  ;;  %344 = vmatpush.msra.mxu0 %v317_v19  ;;  %v323_v40 = vld [vmem:[%s739_s7 + $0x80] sm:$0xff]  ;;  %v300_v44 = vld [vmem:[%s741_s8 + $0x8] sm:$0xff]  ;;  %v306_v46 = vld [vmem:[%s741_s8 + $0x38] sm:$0xff] }
  0x37   : > { %575 = vmatpush.msra.mxu3 %v333_v20  ;;  %373 = vmatpush.msra.mxu1 %v333_v20  ;;  %v303_v41 = vld [vmem:[%s741_s8 + $0x20] sm:$0xff]  ;;  %v301_v47 = vld [vmem:[%s741_s8 + $0x10] sm:$0xff]  ;;  %v302_v48 = vld [vmem:[%s741_s8 + $0x18] sm:$0xff] }
  0x38   : > { %560 = vmatpush.msra.mxu2 %v316_v21  ;;  %345 = vmatpush.msra.mxu0 %v316_v21  ;;  %v299_v43 = vld [vmem:[%s741_s8] sm:$0xff]  ;;  %v295_v50 = vld [vmem:[#allocation2 + $0x10] sm:$0xff]  ;;  %v297_v55 = vld [vmem:[#allocation2 + $0x18] sm:$0xff] }
  0x39   : > { %576 = vmatpush.msra.mxu3 %v332_v22  ;;  %374 = vmatpush.msra.mxu1 %v332_v22  ;;  %v296_v60 = vld [vmem:[#allocation2] sm:$0xff]  ;;  %v298_v1 = vld [vmem:[#allocation2 + $0x8] sm:$0xff] }
  0x3a   : > { %561 = vmatpush.msra.mxu2 %v315_v23  ;;  %346 = vmatpush.msra.mxu0 %v315_v23 }
  0x3b   : > { %577 = vmatpush.msra.mxu3 %v331_v24  ;;  %375 = vmatpush.msra.mxu1 %v331_v24 }
  0x3c   : > { %562 = vmatpush.msra.mxu2 %v314_v25  ;;  %347 = vmatpush.msra.mxu0 %v314_v25 }
  0x3d   : > { %578 = vmatpush.msra.mxu3 %v330_v26  ;;  %376 = vmatpush.msra.mxu1 %v330_v26 }
  0x3e   : > { %563 = vmatpush.msra.mxu2 %v313_v27  ;;  %348 = vmatpush.msra.mxu0 %v313_v27 }
  0x3f   : > { %579 = vmatpush.msra.mxu3 %v329_v28  ;;  %377 = vmatpush.msra.mxu1 %v329_v28 }
  0x40   : > { %564 = vmatpush.msra.mxu2 %v312_v29  ;;  %349 = vmatpush.msra.mxu0 %v312_v29 }
  0x41   : > { %580 = vmatpush.msra.mxu3 %v328_v30  ;;  %378 = vmatpush.msra.mxu1 %v328_v30 }
  0x42   : > { %565 = vmatpush.msra.mxu2 %v311_v31  ;;  %350 = vmatpush.msra.mxu0 %v311_v31 }
  0x43   : > { %581 = vmatpush.msra.mxu3 %v327_v32  ;;  %379 = vmatpush.msra.mxu1 %v327_v32 }
  0x44   : > { %566 = vmatpush.msra.mxu2 %v310_v33  ;;  %351 = vmatpush.msra.mxu0 %v310_v33 }
  0x45   : > { %582 = vmatpush.msra.mxu3 %v326_v34  ;;  %380 = vmatpush.msra.mxu1 %v326_v34 }
  0x46   : > { %567 = vmatpush.msra.mxu2 %v309_v35  ;;  %352 = vmatpush.msra.mxu0 %v309_v35 }
  0x47   : > { %583 = vmatpush.msra.mxu3 %v325_v36  ;;  %381 = vmatpush.msra.mxu1 %v325_v36 }
  0x48   : > { %568 = vmatpush.msra.mxu2 %v308_v37  ;;  %353 = vmatpush.msra.mxu0 %v308_v37 }
  0x49   : > { %584 = vmatpush.msra.mxu3 %v324_v38  ;;  %382 = vmatpush.msra.mxu1 %v324_v38 }
  0x4a   : > { %569 = vmatpush.msra.mxu2 %v307_v39  ;;  %354 = vmatpush.msra.mxu0 %v307_v39 }
  0x4b   : > { %585 = vmatpush.msra.mxu3 %v323_v40  ;;  %361 = vmatmul.f32.vlgmr.msra.gmra.mxu2 %v303_v41 }
  0x4c   : > { %390 = vmatmul.f32.vlgmr.msra.gmra.mxu3 %v304_v42  ;;  %383 = vmatpush.msra.mxu1 %v323_v40 }
  0x4d   : > { %355 = vmatmul.f32.vlgmr.msra.gmra.mxu0 %v299_v43  ;;  %384 = vmatmul.f32.vlgmr.msra.gmra.mxu1 %v300_v44 }
  0x53   : > { %364 = vmatmul.f32.gmra.mxu2 %v305_v45 }
  0x54   : > { %393 = vmatmul.f32.gmra.mxu3 %v306_v46 }
  0x55   : > { %358 = vmatmul.f32.gmra.mxu0 %v301_v47  ;;  %387 = vmatmul.f32.gmra.mxu1 %v302_v48 }
  0xca   : > { %v356_v49 = vpop.f32.mrf.mxu0  ;;  %v385_v51 = vpop.f32.mrf.mxu1 }
  0xcb   : > { %v386_v52 = vadd.f32 %v385_v51, %v356_v49 }
  0xcd   : > { %v397_v53 = vadd.f32 %v386_v52, %v295_v50 }
  0xce   : > { %v362_v54 = vpop.f32.mrf.mxu2 }
  0xcf   : > { %v391_v56 = vpop.f32.mrf.mxu3  ;;  %401 = vst [vmem:[#allocation2 + $0x10] sm:$0xff] %v397_v53 }
  0xd0   : > { %v392_v57 = vadd.f32 %v391_v56, %v362_v54 }
  0xd2   : > { %v399_v58 = vadd.f32 %v392_v57, %v297_v55  ;;  %v359_v59 = vpop.f32.mrf.mxu0  ;;  %v388_v61 = vpop.f32.mrf.mxu1 }
  0xd3   : > { %v389_v62 = vadd.f32 %v388_v61, %v359_v59 }
  0xd4   : > { %403 = vst [vmem:[#allocation2 + $0x18] sm:$0xff] %v399_v58 }
  0xd5   : > { %v398_v63 = vadd.f32 %v389_v62, %v296_v60 }
  0xd6   : > { %v365_v0 = vpop.f32.mrf.mxu2 }
  0xd7   : > { %v394_v2 = vpop.f32.mrf.mxu3  ;;  %402 = vst [vmem:[#allocation2] sm:$0xff] %v398_v63 }
  0xd8   : > { %v395_v3 = vadd.f32 %v394_v2, %v365_v0  ;;  %408 = sbr.rel (%p548_p11) target bundleno = 231 (0xe7), region = 63 }
  0xda   : > { %v400_v4 = vadd.f32 %v395_v3, %v298_v1 }
  0xdc   : > { %404 = vst [vmem:[#allocation2 + $0x8] sm:$0xff] %v400_v4 }
  0xdd   : > { %v409_v5 = vld [vmem:[#allocation2 + $0x10] sm:$0xff]  ;;  %v627_v6 = vld [vmem:[%s817_s2] ss:$0 sm:$0xff]  ;;  %v411_v8 = vld [vmem:[#allocation2 + $0x18] sm:$0xff] }
  0xde   : > { %v410_v7 = vld [vmem:[#allocation2] sm:$0xff]  ;;  %v417_v10 = vadd.f32 %v627_v6, %v409_v5  ;;  %v419_v12 = vadd.f32 %v627_v6, %v411_v8 }
  0xdf   : > { %v418_v11 = vadd.f32 %v627_v6, %v410_v7 }
  0xe0   : > { %421 = vst [vmem:[%s818_s3] sm:$0xff] %v417_v10 }
  0xe1   : > { %422 = vst [vmem:[%s818_s3 + $0x8] sm:$0xff] %v418_v11 }
  0xe2   : > { %423 = vst [vmem:[%s818_s3 + $0x10] sm:$0xff] %v419_v12 }
  0xe3   : > { %v412_v9 = vld [vmem:[#allocation2 + $0x8] sm:$0xff] }
  0xe4   : > { %v420_v13 = vadd.f32 %v627_v6, %v412_v9 }
  0xe6   : > { %424 = vst [vmem:[%s818_s3 + $0x18] sm:$0xff] %v420_v13 }
  0xe7 PF: > { %s13_s16 = sadd.s32 1, %s666_s16   ;;  %s819_s12 = smov %s654_s13 }
  0xe8   : > { %p10_p12 = scmp.ge.s32.totalorder %s13_s16, 4   ;;  %s820_s13 = smov %s724_s20 }
  0xe9   : > { %s821_s14 = smov %s662_s15  ;;  %s822_s15 = smov %s824_s17 }
  0xea   :  { %12 = sbr.rel (!%p10_p12) target bundleno = 3 (0x3), region = 104 }

</bundles_post_ra>
